<compile_context>
chip_gen: v6e
topology: v6e:2x2x1
jax: 0.10.0
libtpu: 0.0.40
codegen_flags: <defaults>
</compile_context>

<pallas_src>
import functools

import jax
import jax.numpy as jnp
from jax import lax
from jax.experimental import pallas as pl
from jax.experimental.pallas import tpu as pltpu

KH = KW = 5
PAD = (KH - 1) // 2


def _sa_kernel(w_ref, x_ref, o_ref, *, C):
    # w_ref: SMEM (2*KH*KW,) f32 -- conv weights, flat (c, ky, kx) row-major,
    #        mean-channel weights pre-scaled by 1/C in the wrapper.
    # x_ref, o_ref: VMEM (NB*C, H, W); H -> sublanes, W -> lanes.
    NBC, H, W = x_ref.shape
    NB = NBC // C

    # Hoisted once: the 50 conv weight scalars from SMEM.
    wv = [w_ref[i] for i in range(2 * KH * KW)]

    # Hoisted once: boundary masks for the zero-padded conv.  Center taps need
    # no mask; masks are shared by every tap and every image in the block.
    row = lax.broadcasted_iota(jnp.int32, (H, W), 0)
    col = lax.broadcasted_iota(jnp.int32, (H, W), 1)
    valid_y = {}
    valid_x = {}
    for k in range(KH):
        d = k - PAD
        if d != 0:
            valid_y[k] = ((row + d) >= 0) & ((row + d) < H)
            valid_x[k] = ((col + d) >= 0) & ((col + d) < W)

    def body(nb, carry):
        base = nb * C

        # ---- ChannelPool (max, sum) with two partial reducers -------------
        p0 = x_ref[base + 0].astype(jnp.float32)
        if C == 1:
            ch_max = p0
            ch_sum = p0
        else:
            p1 = x_ref[base + 1].astype(jnp.float32)
            max_a, max_b = p0, p1
            sum_a, sum_b = p0, p1
            for c in range(2, C):
                xc = x_ref[base + c].astype(jnp.float32)
                if c % 2 == 0:
                    max_a = jnp.maximum(max_a, xc)
                    sum_a = sum_a + xc
                else:
                    max_b = jnp.maximum(max_b, xc)
                    sum_b = sum_b + xc
            ch_max = jnp.maximum(max_a, max_b)
            ch_sum = sum_a + sum_b
        pooled = (ch_max, ch_sum)   # 1/C already folded into the mean weights

        # ---- 5x5 "same" conv (2 -> 1 channels, no bias) --------------------
        # hx[kx](y, x) = p[y, x + dx] (zero-padded); built once per channel.
        # Each (c, ky): weighted row-sum over kx, then ONE vertical roll+mask
        # (rolls on different axes commute with the column mask, and the roll
        # is linear, so weighting before the y-roll is valid).  Two
        # accumulators (ky parity) break the serial add chain.
        accs = [jnp.zeros((H, W), jnp.float32), jnp.zeros((H, W), jnp.float32)]
        for c2 in range(2):
            p = pooled[c2]
            hx = []
            for kx in range(KW):
                dx = kx - PAD
                if dx == 0:
                    hx.append(p)
                else:
                    hx.append(jnp.where(valid_x[kx],
                                        pltpu.roll(p, shift=(-dx) % W, axis=1),
                                        0.0))
            for ky in range(KH):
                b0 = c2 * KH * KW + ky * KW
                rs = ((wv[b0 + 0] * hx[0] + wv[b0 + 1] * hx[1])
                      + (wv[b0 + 2] * hx[2] + wv[b0 + 3] * hx[3])
                      + wv[b0 + 4] * hx[4])
                dy = ky - PAD
                if dy != 0:
                    rs = jnp.where(valid_y[ky],
                                   pltpu.roll(rs, shift=(-dy) % H, axis=0),
                                   0.0)
                accs[ky % 2] = accs[ky % 2] + rs
        acc = accs[0] + accs[1]

        # ---- sigmoid gate ---------------------------------------------------
        # exp + approx reciprocal ride the EUP slot; one Newton step restores
        # f32 accuracy.  Clamp keeps exp finite so the refinement never sees
        # inf (sigmoid(-60) ~ 9e-27 ~ 0).
        den = 1.0 + jnp.exp(-jnp.maximum(acc, -60.0))
        r = pl.reciprocal(den, approx=True)
        scale = r * (2.0 - den * r)

        # Gate in f32, cast once per channel on the way out.
        for c in range(C):
            o_ref[base + c] = (x_ref[base + c].astype(jnp.float32)
                               * scale).astype(o_ref.dtype)
        return carry

    lax.fori_loop(0, NB, body, None, unroll=2)


def sa_layer(x, weight, *, target_block_bytes=2 * 1024 * 1024,
             max_nb=8, min_grid_steps=8):
    """x: (N, C, H, W); weight: (1, 2, KH, KW) f32 (OIHW, no bias)."""
    N, C, H, W = x.shape

    # Fold the ChannelPool mean's 1/C normalization into the mean-channel
    # conv weights (channel index 1 in OIHW order).
    w = weight.astype(jnp.float32).reshape(2, KH, KW)
    w = w.at[1].multiply(1.0 / C)
    w_flat = w.reshape(-1)

    # Images per grid step: MiB-scale blocks for the HBM-streaming gate, but
    # keep >= min_grid_steps grid steps when N allows so the megacore-split
    # "parallel" batch axis still pipelines DMA on each TensorCore (v7x).
    # No N % nb requirement: pl.cdiv grid, ragged last block handled by Pallas.
    per_image = max(1, C * H * W * x.dtype.itemsize)
    nb = max(1, min(max_nb, target_block_bytes // per_image, N))
    if N >= min_grid_steps:
        nb = max(1, min(nb, N // min_grid_steps))
    num_blocks = pl.cdiv(N, nb)

    # Fold (N, C) into one leading dim so the kernel addresses planes with a
    # single (dynamic) index; H/W stay the sublane/lane dims.
    # TODO(synk): for real CNN spatial sizes with H < 8 or W % 128 != 0,
    # repack the spatial dims (pad W to 128 / fold rows into sublanes) around
    # the pallas_call to avoid under-filled vregs and masked stores.
    x3 = x.reshape(N * C, H, W)

    out3 = pl.pallas_call(
        functools.partial(_sa_kernel, C=C),
        out_shape=jax.ShapeDtypeStruct((N * C, H, W), x.dtype),
        grid=(num_blocks,),
        in_specs=[
            pl.BlockSpec(memory_space=pltpu.MemorySpace.SMEM),      # weights
            pl.BlockSpec((nb * C, H, W), lambda n: (n, 0, 0)),      # x planes
        ],
        out_specs=pl.BlockSpec((nb * C, H, W), lambda n: (n, 0, 0)),
        compiler_params=pltpu.CompilerParams(
            dimension_semantics=("parallel",),      # blocks are independent
            vmem_limit_bytes=32 * 1024 * 1024),     # safe on v5e/v6e/v7x
    )(w_flat, x3)
    return out3.reshape(N, C, H, W)


def sa_layer_ref(x, weight):
    """Pure-JAX reference matching the PyTorch SALayer forward."""
    ch_max = jnp.max(x, axis=1, keepdims=True)
    ch_mean = jnp.mean(x, axis=1, keepdims=True)
    pooled = jnp.concatenate([ch_max, ch_mean], axis=1)          # (N, 2, H, W)
    conv = lax.conv_general_dilated(
        pooled, weight, window_strides=(1, 1),
        padding=((PAD, PAD), (PAD, PAD)),
        dimension_numbers=("NCHW", "OIHW", "NCHW"))              # (N, 1, H, W)
    return x * jax.nn.sigmoid(conv)


if __name__ == "__main__":
    key = jax.random.PRNGKey(0)
    k_x, k_w = jax.random.split(key)

    N, C, H, W = 16, 4, 8, 128
    x = jax.random.normal(k_x, (N, C, H, W), dtype=jnp.float32)

    # Deterministic Conv2d-style init: uniform(-1/sqrt(fan_in), 1/sqrt(fan_in)).
    fan_in = 2 * KH * KW
    bound = 1.0 / (fan_in ** 0.5)
    weight = jax.random.uniform(k_w, (1, 2, KH, KW), jnp.float32,
                                minval=-bound, maxval=bound)

    out = jax.block_until_ready(sa_layer(x, weight))

    ref = sa_layer_ref(x, weight)
    assert out.shape == x.shape
    max_err = float(jnp.max(jnp.abs(out - ref)))
    assert max_err < 1e-4, f"mismatch vs reference: {max_err}"

    print("KERNEL_OK")
</pallas_src>

<mosaic_0001>
module attributes {stable_mosaic.version = 11 : i64} {
  func.func @_sa_kernel(%arg0: i32, %arg1: memref<50xf32, #tpu.memory_space<smem>>, %arg2: memref<8x8x128xf32, #tpu.memory_space<vmem>>, %arg3: memref<8x8x128xf32, #tpu.memory_space<vmem>>) attributes {dimension_semantics = [#tpu.dimension_semantics<parallel>], iteration_bounds = array<i64: 8>, scalar_prefetch = 0 : i64, scratch_operands = 0 : i64, tpu.core_type = #tpu.core_type<tc>, window_params = [{transform_indices = @transform_0, window_bounds = array<i64: 50>}, {transform_indices = @transform_1, window_bounds = array<i64: 8, 8, 128>}, {transform_indices = @transform_2, window_bounds = array<i64: 8, 8, 128>}]} {
    %c0 = arith.constant 0 : index
    %0 = memref.load %arg1[%c0] : memref<50xf32, #tpu.memory_space<smem>>
    %c1 = arith.constant 1 : index
    %1 = memref.load %arg1[%c1] : memref<50xf32, #tpu.memory_space<smem>>
    %c2 = arith.constant 2 : index
    %2 = memref.load %arg1[%c2] : memref<50xf32, #tpu.memory_space<smem>>
    %c3 = arith.constant 3 : index
    %3 = memref.load %arg1[%c3] : memref<50xf32, #tpu.memory_space<smem>>
    %c4 = arith.constant 4 : index
    %4 = memref.load %arg1[%c4] : memref<50xf32, #tpu.memory_space<smem>>
    %c5 = arith.constant 5 : index
    %5 = memref.load %arg1[%c5] : memref<50xf32, #tpu.memory_space<smem>>
    %c6 = arith.constant 6 : index
    %6 = memref.load %arg1[%c6] : memref<50xf32, #tpu.memory_space<smem>>
    %c7 = arith.constant 7 : index
    %7 = memref.load %arg1[%c7] : memref<50xf32, #tpu.memory_space<smem>>
    %c8 = arith.constant 8 : index
    %8 = memref.load %arg1[%c8] : memref<50xf32, #tpu.memory_space<smem>>
    %c9 = arith.constant 9 : index
    %9 = memref.load %arg1[%c9] : memref<50xf32, #tpu.memory_space<smem>>
    %c10 = arith.constant 10 : index
    %10 = memref.load %arg1[%c10] : memref<50xf32, #tpu.memory_space<smem>>
    %c11 = arith.constant 11 : index
    %11 = memref.load %arg1[%c11] : memref<50xf32, #tpu.memory_space<smem>>
    %c12 = arith.constant 12 : index
    %12 = memref.load %arg1[%c12] : memref<50xf32, #tpu.memory_space<smem>>
    %c13 = arith.constant 13 : index
    %13 = memref.load %arg1[%c13] : memref<50xf32, #tpu.memory_space<smem>>
    %c14 = arith.constant 14 : index
    %14 = memref.load %arg1[%c14] : memref<50xf32, #tpu.memory_space<smem>>
    %c15 = arith.constant 15 : index
    %15 = memref.load %arg1[%c15] : memref<50xf32, #tpu.memory_space<smem>>
    %c16 = arith.constant 16 : index
    %16 = memref.load %arg1[%c16] : memref<50xf32, #tpu.memory_space<smem>>
    %c17 = arith.constant 17 : index
    %17 = memref.load %arg1[%c17] : memref<50xf32, #tpu.memory_space<smem>>
    %c18 = arith.constant 18 : index
    %18 = memref.load %arg1[%c18] : memref<50xf32, #tpu.memory_space<smem>>
    %c19 = arith.constant 19 : index
    %19 = memref.load %arg1[%c19] : memref<50xf32, #tpu.memory_space<smem>>
    %c20 = arith.constant 20 : index
    %20 = memref.load %arg1[%c20] : memref<50xf32, #tpu.memory_space<smem>>
    %c21 = arith.constant 21 : index
    %21 = memref.load %arg1[%c21] : memref<50xf32, #tpu.memory_space<smem>>
    %c22 = arith.constant 22 : index
    %22 = memref.load %arg1[%c22] : memref<50xf32, #tpu.memory_space<smem>>
    %c23 = arith.constant 23 : index
    %23 = memref.load %arg1[%c23] : memref<50xf32, #tpu.memory_space<smem>>
    %c24 = arith.constant 24 : index
    %24 = memref.load %arg1[%c24] : memref<50xf32, #tpu.memory_space<smem>>
    %c25 = arith.constant 25 : index
    %25 = memref.load %arg1[%c25] : memref<50xf32, #tpu.memory_space<smem>>
    %c26 = arith.constant 26 : index
    %26 = memref.load %arg1[%c26] : memref<50xf32, #tpu.memory_space<smem>>
    %c27 = arith.constant 27 : index
    %27 = memref.load %arg1[%c27] : memref<50xf32, #tpu.memory_space<smem>>
    %c28 = arith.constant 28 : index
    %28 = memref.load %arg1[%c28] : memref<50xf32, #tpu.memory_space<smem>>
    %c29 = arith.constant 29 : index
    %29 = memref.load %arg1[%c29] : memref<50xf32, #tpu.memory_space<smem>>
    %c30 = arith.constant 30 : index
    %30 = memref.load %arg1[%c30] : memref<50xf32, #tpu.memory_space<smem>>
    %c31 = arith.constant 31 : index
    %31 = memref.load %arg1[%c31] : memref<50xf32, #tpu.memory_space<smem>>
    %c32 = arith.constant 32 : index
    %32 = memref.load %arg1[%c32] : memref<50xf32, #tpu.memory_space<smem>>
    %c33 = arith.constant 33 : index
    %33 = memref.load %arg1[%c33] : memref<50xf32, #tpu.memory_space<smem>>
    %c34 = arith.constant 34 : index
    %34 = memref.load %arg1[%c34] : memref<50xf32, #tpu.memory_space<smem>>
    %c35 = arith.constant 35 : index
    %35 = memref.load %arg1[%c35] : memref<50xf32, #tpu.memory_space<smem>>
    %c36 = arith.constant 36 : index
    %36 = memref.load %arg1[%c36] : memref<50xf32, #tpu.memory_space<smem>>
    %c37 = arith.constant 37 : index
    %37 = memref.load %arg1[%c37] : memref<50xf32, #tpu.memory_space<smem>>
    %c38 = arith.constant 38 : index
    %38 = memref.load %arg1[%c38] : memref<50xf32, #tpu.memory_space<smem>>
    %c39 = arith.constant 39 : index
    %39 = memref.load %arg1[%c39] : memref<50xf32, #tpu.memory_space<smem>>
    %c40 = arith.constant 40 : index
    %40 = memref.load %arg1[%c40] : memref<50xf32, #tpu.memory_space<smem>>
    %c41 = arith.constant 41 : index
    %41 = memref.load %arg1[%c41] : memref<50xf32, #tpu.memory_space<smem>>
    %c42 = arith.constant 42 : index
    %42 = memref.load %arg1[%c42] : memref<50xf32, #tpu.memory_space<smem>>
    %c43 = arith.constant 43 : index
    %43 = memref.load %arg1[%c43] : memref<50xf32, #tpu.memory_space<smem>>
    %c44 = arith.constant 44 : index
    %44 = memref.load %arg1[%c44] : memref<50xf32, #tpu.memory_space<smem>>
    %c45 = arith.constant 45 : index
    %45 = memref.load %arg1[%c45] : memref<50xf32, #tpu.memory_space<smem>>
    %c46 = arith.constant 46 : index
    %46 = memref.load %arg1[%c46] : memref<50xf32, #tpu.memory_space<smem>>
    %c47 = arith.constant 47 : index
    %47 = memref.load %arg1[%c47] : memref<50xf32, #tpu.memory_space<smem>>
    %c48 = arith.constant 48 : index
    %48 = memref.load %arg1[%c48] : memref<50xf32, #tpu.memory_space<smem>>
    %c49 = arith.constant 49 : index
    %49 = memref.load %arg1[%c49] : memref<50xf32, #tpu.memory_space<smem>>
    %50 = tpu.iota {dimensions = array<i32: 0>} : vector<8x128xi32>
    %51 = tpu.iota {dimensions = array<i32: 1>} : vector<8x128xi32>
    %c-2_i32 = arith.constant -2 : i32
    %52 = vector.broadcast %c-2_i32 : i32 to vector<8x128xi32>
    %53 = arith.addi %50, %52 : vector<8x128xi32>
    %c0_i32 = arith.constant 0 : i32
    %54 = vector.broadcast %c0_i32 : i32 to vector<8x128xi32>
    %55 = arith.cmpi sge, %53, %54 : vector<8x128xi32>
    %c-2_i32_0 = arith.constant -2 : i32
    %56 = vector.broadcast %c-2_i32_0 : i32 to vector<8x128xi32>
    %57 = arith.addi %50, %56 : vector<8x128xi32>
    %c8_i32 = arith.constant 8 : i32
    %58 = vector.broadcast %c8_i32 : i32 to vector<8x128xi32>
    %59 = arith.cmpi slt, %57, %58 : vector<8x128xi32>
    %60 = arith.andi %55, %59 : vector<8x128xi1>
    %c-2_i32_1 = arith.constant -2 : i32
    %61 = vector.broadcast %c-2_i32_1 : i32 to vector<8x128xi32>
    %62 = arith.addi %51, %61 : vector<8x128xi32>
    %c0_i32_2 = arith.constant 0 : i32
    %63 = vector.broadcast %c0_i32_2 : i32 to vector<8x128xi32>
    %64 = arith.cmpi sge, %62, %63 : vector<8x128xi32>
    %c-2_i32_3 = arith.constant -2 : i32
    %65 = vector.broadcast %c-2_i32_3 : i32 to vector<8x128xi32>
    %66 = arith.addi %51, %65 : vector<8x128xi32>
    %c128_i32 = arith.constant 128 : i32
    %67 = vector.broadcast %c128_i32 : i32 to vector<8x128xi32>
    %68 = arith.cmpi slt, %66, %67 : vector<8x128xi32>
    %69 = arith.andi %64, %68 : vector<8x128xi1>
    %c-1_i32 = arith.constant -1 : i32
    %70 = vector.broadcast %c-1_i32 : i32 to vector<8x128xi32>
    %71 = arith.addi %50, %70 : vector<8x128xi32>
    %c0_i32_4 = arith.constant 0 : i32
    %72 = vector.broadcast %c0_i32_4 : i32 to vector<8x128xi32>
    %73 = arith.cmpi sge, %71, %72 : vector<8x128xi32>
    %c-1_i32_5 = arith.constant -1 : i32
    %74 = vector.broadcast %c-1_i32_5 : i32 to vector<8x128xi32>
    %75 = arith.addi %50, %74 : vector<8x128xi32>
    %c8_i32_6 = arith.constant 8 : i32
    %76 = vector.broadcast %c8_i32_6 : i32 to vector<8x128xi32>
    %77 = arith.cmpi slt, %75, %76 : vector<8x128xi32>
    %78 = arith.andi %73, %77 : vector<8x128xi1>
    %c-1_i32_7 = arith.constant -1 : i32
    %79 = vector.broadcast %c-1_i32_7 : i32 to vector<8x128xi32>
    %80 = arith.addi %51, %79 : vector<8x128xi32>
    %c0_i32_8 = arith.constant 0 : i32
    %81 = vector.broadcast %c0_i32_8 : i32 to vector<8x128xi32>
    %82 = arith.cmpi sge, %80, %81 : vector<8x128xi32>
    %c-1_i32_9 = arith.constant -1 : i32
    %83 = vector.broadcast %c-1_i32_9 : i32 to vector<8x128xi32>
    %84 = arith.addi %51, %83 : vector<8x128xi32>
    %c128_i32_10 = arith.constant 128 : i32
    %85 = vector.broadcast %c128_i32_10 : i32 to vector<8x128xi32>
    %86 = arith.cmpi slt, %84, %85 : vector<8x128xi32>
    %87 = arith.andi %82, %86 : vector<8x128xi1>
    %c1_i32 = arith.constant 1 : i32
    %88 = vector.broadcast %c1_i32 : i32 to vector<8x128xi32>
    %89 = arith.addi %50, %88 : vector<8x128xi32>
    %c0_i32_11 = arith.constant 0 : i32
    %90 = vector.broadcast %c0_i32_11 : i32 to vector<8x128xi32>
    %91 = arith.cmpi sge, %89, %90 : vector<8x128xi32>
    %c1_i32_12 = arith.constant 1 : i32
    %92 = vector.broadcast %c1_i32_12 : i32 to vector<8x128xi32>
    %93 = arith.addi %50, %92 : vector<8x128xi32>
    %c8_i32_13 = arith.constant 8 : i32
    %94 = vector.broadcast %c8_i32_13 : i32 to vector<8x128xi32>
    %95 = arith.cmpi slt, %93, %94 : vector<8x128xi32>
    %96 = arith.andi %91, %95 : vector<8x128xi1>
    %c1_i32_14 = arith.constant 1 : i32
    %97 = vector.broadcast %c1_i32_14 : i32 to vector<8x128xi32>
    %98 = arith.addi %51, %97 : vector<8x128xi32>
    %c0_i32_15 = arith.constant 0 : i32
    %99 = vector.broadcast %c0_i32_15 : i32 to vector<8x128xi32>
    %100 = arith.cmpi sge, %98, %99 : vector<8x128xi32>
    %c1_i32_16 = arith.constant 1 : i32
    %101 = vector.broadcast %c1_i32_16 : i32 to vector<8x128xi32>
    %102 = arith.addi %51, %101 : vector<8x128xi32>
    %c128_i32_17 = arith.constant 128 : i32
    %103 = vector.broadcast %c128_i32_17 : i32 to vector<8x128xi32>
    %104 = arith.cmpi slt, %102, %103 : vector<8x128xi32>
    %105 = arith.andi %100, %104 : vector<8x128xi1>
    %c2_i32 = arith.constant 2 : i32
    %106 = vector.broadcast %c2_i32 : i32 to vector<8x128xi32>
    %107 = arith.addi %50, %106 : vector<8x128xi32>
    %c0_i32_18 = arith.constant 0 : i32
    %108 = vector.broadcast %c0_i32_18 : i32 to vector<8x128xi32>
    %109 = arith.cmpi sge, %107, %108 : vector<8x128xi32>
    %c2_i32_19 = arith.constant 2 : i32
    %110 = vector.broadcast %c2_i32_19 : i32 to vector<8x128xi32>
    %111 = arith.addi %50, %110 : vector<8x128xi32>
    %c8_i32_20 = arith.constant 8 : i32
    %112 = vector.broadcast %c8_i32_20 : i32 to vector<8x128xi32>
    %113 = arith.cmpi slt, %111, %112 : vector<8x128xi32>
    %114 = arith.andi %109, %113 : vector<8x128xi1>
    %c2_i32_21 = arith.constant 2 : i32
    %115 = vector.broadcast %c2_i32_21 : i32 to vector<8x128xi32>
    %116 = arith.addi %51, %115 : vector<8x128xi32>
    %c0_i32_22 = arith.constant 0 : i32
    %117 = vector.broadcast %c0_i32_22 : i32 to vector<8x128xi32>
    %118 = arith.cmpi sge, %116, %117 : vector<8x128xi32>
    %c2_i32_23 = arith.constant 2 : i32
    %119 = vector.broadcast %c2_i32_23 : i32 to vector<8x128xi32>
    %120 = arith.addi %51, %119 : vector<8x128xi32>
    %c128_i32_24 = arith.constant 128 : i32
    %121 = vector.broadcast %c128_i32_24 : i32 to vector<8x128xi32>
    %122 = arith.cmpi slt, %120, %121 : vector<8x128xi32>
    %123 = arith.andi %118, %122 : vector<8x128xi1>
    %c0_i32_25 = arith.constant 0 : i32
    %c4_i32 = arith.constant 4 : i32
    %124 = arith.muli %c0_i32_25, %c4_i32 : i32
    %c0_i32_26 = arith.constant 0 : i32
    %125 = arith.addi %124, %c0_i32_26 : i32
    %126 = arith.index_cast %125 : i32 to index
    %c0_27 = arith.constant 0 : index
    %c0_28 = arith.constant 0 : index
    %127 = vector.load %arg2[%126, %c0_27, %c0_28] : memref<8x8x128xf32, #tpu.memory_space<vmem>>, vector<1x8x128xf32>
    %128 = vector.shape_cast %127 : vector<1x8x128xf32> to vector<8x128xf32>
    %c1_i32_29 = arith.constant 1 : i32
    %129 = arith.addi %124, %c1_i32_29 : i32
    %130 = arith.index_cast %129 : i32 to index
    %c0_30 = arith.constant 0 : index
    %c0_31 = arith.constant 0 : index
    %131 = vector.load %arg2[%130, %c0_30, %c0_31] : memref<8x8x128xf32, #tpu.memory_space<vmem>>, vector<1x8x128xf32>
    %132 = vector.shape_cast %131 : vector<1x8x128xf32> to vector<8x128xf32>
    %c2_i32_32 = arith.constant 2 : i32
    %133 = arith.addi %124, %c2_i32_32 : i32
    %134 = arith.index_cast %133 : i32 to index
    %c0_33 = arith.constant 0 : index
    %c0_34 = arith.constant 0 : index
    %135 = vector.load %arg2[%134, %c0_33, %c0_34] : memref<8x8x128xf32, #tpu.memory_space<vmem>>, vector<1x8x128xf32>
    %136 = vector.shape_cast %135 : vector<1x8x128xf32> to vector<8x128xf32>
    %137 = arith.maximumf %128, %136 : vector<8x128xf32>
    %138 = arith.addf %128, %136 : vector<8x128xf32>
    %c3_i32 = arith.constant 3 : i32
    %139 = arith.addi %124, %c3_i32 : i32
    %140 = arith.index_cast %139 : i32 to index
    %c0_35 = arith.constant 0 : index
    %c0_36 = arith.constant 0 : index
    %141 = vector.load %arg2[%140, %c0_35, %c0_36] : memref<8x8x128xf32, #tpu.memory_space<vmem>>, vector<1x8x128xf32>
    %142 = vector.shape_cast %141 : vector<1x8x128xf32> to vector<8x128xf32>
    %143 = arith.maximumf %132, %142 : vector<8x128xf32>
    %144 = arith.addf %132, %142 : vector<8x128xf32>
    %145 = arith.maximumf %137, %143 : vector<8x128xf32>
    %146 = arith.addf %138, %144 : vector<8x128xf32>
    %cst = arith.constant 0.000000e+00 : f32
    %147 = vector.broadcast %cst : f32 to vector<8x128xf32>
    %cst_37 = arith.constant 0.000000e+00 : f32
    %148 = vector.broadcast %cst_37 : f32 to vector<8x128xf32>
    %c2_i32_38 = arith.constant 2 : i32
    %149 = tpu.dynamic_rotate %145 by %c2_i32_38 dim 1 : vector<8x128xf32>, i32 -> vector<8x128xf32>
    %cst_39 = arith.constant 0.000000e+00 : f32
    %150 = vector.broadcast %cst_39 : f32 to vector<8x128xf32>
    %151 = arith.select %69, %149, %150 : vector<8x128xi1>, vector<8x128xf32>
    %c1_i32_40 = arith.constant 1 : i32
    %152 = tpu.dynamic_rotate %145 by %c1_i32_40 dim 1 : vector<8x128xf32>, i32 -> vector<8x128xf32>
    %cst_41 = arith.constant 0.000000e+00 : f32
    %153 = vector.broadcast %cst_41 : f32 to vector<8x128xf32>
    %154 = arith.select %87, %152, %153 : vector<8x128xi1>, vector<8x128xf32>
    %c127_i32 = arith.constant 127 : i32
    %155 = tpu.dynamic_rotate %145 by %c127_i32 dim 1 : vector<8x128xf32>, i32 -> vector<8x128xf32>
    %cst_42 = arith.constant 0.000000e+00 : f32
    %156 = vector.broadcast %cst_42 : f32 to vector<8x128xf32>
    %157 = arith.select %105, %155, %156 : vector<8x128xi1>, vector<8x128xf32>
    %c126_i32 = arith.constant 126 : i32
    %158 = tpu.dynamic_rotate %145 by %c126_i32 dim 1 : vector<8x128xf32>, i32 -> vector<8x128xf32>
    %cst_43 = arith.constant 0.000000e+00 : f32
    %159 = vector.broadcast %cst_43 : f32 to vector<8x128xf32>
    %160 = arith.select %123, %158, %159 : vector<8x128xi1>, vector<8x128xf32>
    %161 = vector.broadcast %0 : f32 to vector<8x128xf32>
    %162 = arith.mulf %161, %151 : vector<8x128xf32>
    %163 = vector.broadcast %1 : f32 to vector<8x128xf32>
    %164 = arith.mulf %163, %154 : vector<8x128xf32>
    %165 = arith.addf %162, %164 : vector<8x128xf32>
    %166 = vector.broadcast %2 : f32 to vector<8x128xf32>
    %167 = arith.mulf %166, %145 : vector<8x128xf32>
    %168 = vector.broadcast %3 : f32 to vector<8x128xf32>
    %169 = arith.mulf %168, %157 : vector<8x128xf32>
    %170 = arith.addf %167, %169 : vector<8x128xf32>
    %171 = arith.addf %165, %170 : vector<8x128xf32>
    %172 = vector.broadcast %4 : f32 to vector<8x128xf32>
    %173 = arith.mulf %172, %160 : vector<8x128xf32>
    %174 = arith.addf %171, %173 : vector<8x128xf32>
    %c2_i32_44 = arith.constant 2 : i32
    %175 = tpu.dynamic_rotate %174 by %c2_i32_44 dim 0 : vector<8x128xf32>, i32 -> vector<8x128xf32>
    %cst_45 = arith.constant 0.000000e+00 : f32
    %176 = vector.broadcast %cst_45 : f32 to vector<8x128xf32>
    %177 = arith.select %60, %175, %176 : vector<8x128xi1>, vector<8x128xf32>
    %178 = arith.addf %147, %177 : vector<8x128xf32>
    %179 = vector.broadcast %5 : f32 to vector<8x128xf32>
    %180 = arith.mulf %179, %151 : vector<8x128xf32>
    %181 = vector.broadcast %6 : f32 to vector<8x128xf32>
    %182 = arith.mulf %181, %154 : vector<8x128xf32>
    %183 = arith.addf %180, %182 : vector<8x128xf32>
    %184 = vector.broadcast %7 : f32 to vector<8x128xf32>
    %185 = arith.mulf %184, %145 : vector<8x128xf32>
    %186 = vector.broadcast %8 : f32 to vector<8x128xf32>
    %187 = arith.mulf %186, %157 : vector<8x128xf32>
    %188 = arith.addf %185, %187 : vector<8x128xf32>
    %189 = arith.addf %183, %188 : vector<8x128xf32>
    %190 = vector.broadcast %9 : f32 to vector<8x128xf32>
    %191 = arith.mulf %190, %160 : vector<8x128xf32>
    %192 = arith.addf %189, %191 : vector<8x128xf32>
    %c1_i32_46 = arith.constant 1 : i32
    %193 = tpu.dynamic_rotate %192 by %c1_i32_46 dim 0 : vector<8x128xf32>, i32 -> vector<8x128xf32>
    %cst_47 = arith.constant 0.000000e+00 : f32
    %194 = vector.broadcast %cst_47 : f32 to vector<8x128xf32>
    %195 = arith.select %78, %193, %194 : vector<8x128xi1>, vector<8x128xf32>
    %196 = arith.addf %148, %195 : vector<8x128xf32>
    %197 = vector.broadcast %10 : f32 to vector<8x128xf32>
    %198 = arith.mulf %197, %151 : vector<8x128xf32>
    %199 = vector.broadcast %11 : f32 to vector<8x128xf32>
    %200 = arith.mulf %199, %154 : vector<8x128xf32>
    %201 = arith.addf %198, %200 : vector<8x128xf32>
    %202 = vector.broadcast %12 : f32 to vector<8x128xf32>
    %203 = arith.mulf %202, %145 : vector<8x128xf32>
    %204 = vector.broadcast %13 : f32 to vector<8x128xf32>
    %205 = arith.mulf %204, %157 : vector<8x128xf32>
    %206 = arith.addf %203, %205 : vector<8x128xf32>
    %207 = arith.addf %201, %206 : vector<8x128xf32>
    %208 = vector.broadcast %14 : f32 to vector<8x128xf32>
    %209 = arith.mulf %208, %160 : vector<8x128xf32>
    %210 = arith.addf %207, %209 : vector<8x128xf32>
    %211 = arith.addf %178, %210 : vector<8x128xf32>
    %212 = vector.broadcast %15 : f32 to vector<8x128xf32>
    %213 = arith.mulf %212, %151 : vector<8x128xf32>
    %214 = vector.broadcast %16 : f32 to vector<8x128xf32>
    %215 = arith.mulf %214, %154 : vector<8x128xf32>
    %216 = arith.addf %213, %215 : vector<8x128xf32>
    %217 = vector.broadcast %17 : f32 to vector<8x128xf32>
    %218 = arith.mulf %217, %145 : vector<8x128xf32>
    %219 = vector.broadcast %18 : f32 to vector<8x128xf32>
    %220 = arith.mulf %219, %157 : vector<8x128xf32>
    %221 = arith.addf %218, %220 : vector<8x128xf32>
    %222 = arith.addf %216, %221 : vector<8x128xf32>
    %223 = vector.broadcast %19 : f32 to vector<8x128xf32>
    %224 = arith.mulf %223, %160 : vector<8x128xf32>
    %225 = arith.addf %222, %224 : vector<8x128xf32>
    %c7_i32 = arith.constant 7 : i32
    %226 = tpu.dynamic_rotate %225 by %c7_i32 dim 0 : vector<8x128xf32>, i32 -> vector<8x128xf32>
    %cst_48 = arith.constant 0.000000e+00 : f32
    %227 = vector.broadcast %cst_48 : f32 to vector<8x128xf32>
    %228 = arith.select %96, %226, %227 : vector<8x128xi1>, vector<8x128xf32>
    %229 = arith.addf %196, %228 : vector<8x128xf32>
    %230 = vector.broadcast %20 : f32 to vector<8x128xf32>
    %231 = arith.mulf %230, %151 : vector<8x128xf32>
    %232 = vector.broadcast %21 : f32 to vector<8x128xf32>
    %233 = arith.mulf %232, %154 : vector<8x128xf32>
    %234 = arith.addf %231, %233 : vector<8x128xf32>
    %235 = vector.broadcast %22 : f32 to vector<8x128xf32>
    %236 = arith.mulf %235, %145 : vector<8x128xf32>
    %237 = vector.broadcast %23 : f32 to vector<8x128xf32>
    %238 = arith.mulf %237, %157 : vector<8x128xf32>
    %239 = arith.addf %236, %238 : vector<8x128xf32>
    %240 = arith.addf %234, %239 : vector<8x128xf32>
    %241 = vector.broadcast %24 : f32 to vector<8x128xf32>
    %242 = arith.mulf %241, %160 : vector<8x128xf32>
    %243 = arith.addf %240, %242 : vector<8x128xf32>
    %c6_i32 = arith.constant 6 : i32
    %244 = tpu.dynamic_rotate %243 by %c6_i32 dim 0 : vector<8x128xf32>, i32 -> vector<8x128xf32>
    %cst_49 = arith.constant 0.000000e+00 : f32
    %245 = vector.broadcast %cst_49 : f32 to vector<8x128xf32>
    %246 = arith.select %114, %244, %245 : vector<8x128xi1>, vector<8x128xf32>
    %247 = arith.addf %211, %246 : vector<8x128xf32>
    %c2_i32_50 = arith.constant 2 : i32
    %248 = tpu.dynamic_rotate %146 by %c2_i32_50 dim 1 : vector<8x128xf32>, i32 -> vector<8x128xf32>
    %cst_51 = arith.constant 0.000000e+00 : f32
    %249 = vector.broadcast %cst_51 : f32 to vector<8x128xf32>
    %250 = arith.select %69, %248, %249 : vector<8x128xi1>, vector<8x128xf32>
    %c1_i32_52 = arith.constant 1 : i32
    %251 = tpu.dynamic_rotate %146 by %c1_i32_52 dim 1 : vector<8x128xf32>, i32 -> vector<8x128xf32>
    %cst_53 = arith.constant 0.000000e+00 : f32
    %252 = vector.broadcast %cst_53 : f32 to vector<8x128xf32>
    %253 = arith.select %87, %251, %252 : vector<8x128xi1>, vector<8x128xf32>
    %c127_i32_54 = arith.constant 127 : i32
    %254 = tpu.dynamic_rotate %146 by %c127_i32_54 dim 1 : vector<8x128xf32>, i32 -> vector<8x128xf32>
    %cst_55 = arith.constant 0.000000e+00 : f32
    %255 = vector.broadcast %cst_55 : f32 to vector<8x128xf32>
    %256 = arith.select %105, %254, %255 : vector<8x128xi1>, vector<8x128xf32>
    %c126_i32_56 = arith.constant 126 : i32
    %257 = tpu.dynamic_rotate %146 by %c126_i32_56 dim 1 : vector<8x128xf32>, i32 -> vector<8x128xf32>
    %cst_57 = arith.constant 0.000000e+00 : f32
    %258 = vector.broadcast %cst_57 : f32 to vector<8x128xf32>
    %259 = arith.select %123, %257, %258 : vector<8x128xi1>, vector<8x128xf32>
    %260 = vector.broadcast %25 : f32 to vector<8x128xf32>
    %261 = arith.mulf %260, %250 : vector<8x128xf32>
    %262 = vector.broadcast %26 : f32 to vector<8x128xf32>
    %263 = arith.mulf %262, %253 : vector<8x128xf32>
    %264 = arith.addf %261, %263 : vector<8x128xf32>
    %265 = vector.broadcast %27 : f32 to vector<8x128xf32>
    %266 = arith.mulf %265, %146 : vector<8x128xf32>
    %267 = vector.broadcast %28 : f32 to vector<8x128xf32>
    %268 = arith.mulf %267, %256 : vector<8x128xf32>
    %269 = arith.addf %266, %268 : vector<8x128xf32>
    %270 = arith.addf %264, %269 : vector<8x128xf32>
    %271 = vector.broadcast %29 : f32 to vector<8x128xf32>
    %272 = arith.mulf %271, %259 : vector<8x128xf32>
    %273 = arith.addf %270, %272 : vector<8x128xf32>
    %c2_i32_58 = arith.constant 2 : i32
    %274 = tpu.dynamic_rotate %273 by %c2_i32_58 dim 0 : vector<8x128xf32>, i32 -> vector<8x128xf32>
    %cst_59 = arith.constant 0.000000e+00 : f32
    %275 = vector.broadcast %cst_59 : f32 to vector<8x128xf32>
    %276 = arith.select %60, %274, %275 : vector<8x128xi1>, vector<8x128xf32>
    %277 = arith.addf %247, %276 : vector<8x128xf32>
    %278 = vector.broadcast %30 : f32 to vector<8x128xf32>
    %279 = arith.mulf %278, %250 : vector<8x128xf32>
    %280 = vector.broadcast %31 : f32 to vector<8x128xf32>
    %281 = arith.mulf %280, %253 : vector<8x128xf32>
    %282 = arith.addf %279, %281 : vector<8x128xf32>
    %283 = vector.broadcast %32 : f32 to vector<8x128xf32>
    %284 = arith.mulf %283, %146 : vector<8x128xf32>
    %285 = vector.broadcast %33 : f32 to vector<8x128xf32>
    %286 = arith.mulf %285, %256 : vector<8x128xf32>
    %287 = arith.addf %284, %286 : vector<8x128xf32>
    %288 = arith.addf %282, %287 : vector<8x128xf32>
    %289 = vector.broadcast %34 : f32 to vector<8x128xf32>
    %290 = arith.mulf %289, %259 : vector<8x128xf32>
    %291 = arith.addf %288, %290 : vector<8x128xf32>
    %c1_i32_60 = arith.constant 1 : i32
    %292 = tpu.dynamic_rotate %291 by %c1_i32_60 dim 0 : vector<8x128xf32>, i32 -> vector<8x128xf32>
    %cst_61 = arith.constant 0.000000e+00 : f32
    %293 = vector.broadcast %cst_61 : f32 to vector<8x128xf32>
    %294 = arith.select %78, %292, %293 : vector<8x128xi1>, vector<8x128xf32>
    %295 = arith.addf %229, %294 : vector<8x128xf32>
    %296 = vector.broadcast %35 : f32 to vector<8x128xf32>
    %297 = arith.mulf %296, %250 : vector<8x128xf32>
    %298 = vector.broadcast %36 : f32 to vector<8x128xf32>
    %299 = arith.mulf %298, %253 : vector<8x128xf32>
    %300 = arith.addf %297, %299 : vector<8x128xf32>
    %301 = vector.broadcast %37 : f32 to vector<8x128xf32>
    %302 = arith.mulf %301, %146 : vector<8x128xf32>
    %303 = vector.broadcast %38 : f32 to vector<8x128xf32>
    %304 = arith.mulf %303, %256 : vector<8x128xf32>
    %305 = arith.addf %302, %304 : vector<8x128xf32>
    %306 = arith.addf %300, %305 : vector<8x128xf32>
    %307 = vector.broadcast %39 : f32 to vector<8x128xf32>
    %308 = arith.mulf %307, %259 : vector<8x128xf32>
    %309 = arith.addf %306, %308 : vector<8x128xf32>
    %310 = arith.addf %277, %309 : vector<8x128xf32>
    %311 = vector.broadcast %40 : f32 to vector<8x128xf32>
    %312 = arith.mulf %311, %250 : vector<8x128xf32>
    %313 = vector.broadcast %41 : f32 to vector<8x128xf32>
    %314 = arith.mulf %313, %253 : vector<8x128xf32>
    %315 = arith.addf %312, %314 : vector<8x128xf32>
    %316 = vector.broadcast %42 : f32 to vector<8x128xf32>
    %317 = arith.mulf %316, %146 : vector<8x128xf32>
    %318 = vector.broadcast %43 : f32 to vector<8x128xf32>
    %319 = arith.mulf %318, %256 : vector<8x128xf32>
    %320 = arith.addf %317, %319 : vector<8x128xf32>
    %321 = arith.addf %315, %320 : vector<8x128xf32>
    %322 = vector.broadcast %44 : f32 to vector<8x128xf32>
    %323 = arith.mulf %322, %259 : vector<8x128xf32>
    %324 = arith.addf %321, %323 : vector<8x128xf32>
    %c7_i32_62 = arith.constant 7 : i32
    %325 = tpu.dynamic_rotate %324 by %c7_i32_62 dim 0 : vector<8x128xf32>, i32 -> vector<8x128xf32>
    %cst_63 = arith.constant 0.000000e+00 : f32
    %326 = vector.broadcast %cst_63 : f32 to vector<8x128xf32>
    %327 = arith.select %96, %325, %326 : vector<8x128xi1>, vector<8x128xf32>
    %328 = arith.addf %295, %327 : vector<8x128xf32>
    %329 = vector.broadcast %45 : f32 to vector<8x128xf32>
    %330 = arith.mulf %329, %250 : vector<8x128xf32>
    %331 = vector.broadcast %46 : f32 to vector<8x128xf32>
    %332 = arith.mulf %331, %253 : vector<8x128xf32>
    %333 = arith.addf %330, %332 : vector<8x128xf32>
    %334 = vector.broadcast %47 : f32 to vector<8x128xf32>
    %335 = arith.mulf %334, %146 : vector<8x128xf32>
    %336 = vector.broadcast %48 : f32 to vector<8x128xf32>
    %337 = arith.mulf %336, %256 : vector<8x128xf32>
    %338 = arith.addf %335, %337 : vector<8x128xf32>
    %339 = arith.addf %333, %338 : vector<8x128xf32>
    %340 = vector.broadcast %49 : f32 to vector<8x128xf32>
    %341 = arith.mulf %340, %259 : vector<8x128xf32>
    %342 = arith.addf %339, %341 : vector<8x128xf32>
    %c6_i32_64 = arith.constant 6 : i32
    %343 = tpu.dynamic_rotate %342 by %c6_i32_64 dim 0 : vector<8x128xf32>, i32 -> vector<8x128xf32>
    %cst_65 = arith.constant 0.000000e+00 : f32
    %344 = vector.broadcast %cst_65 : f32 to vector<8x128xf32>
    %345 = arith.select %114, %343, %344 : vector<8x128xi1>, vector<8x128xf32>
    %346 = arith.addf %310, %345 : vector<8x128xf32>
    %347 = arith.addf %346, %328 : vector<8x128xf32>
    %cst_66 = arith.constant -6.000000e+01 : f32
    %348 = vector.broadcast %cst_66 : f32 to vector<8x128xf32>
    %349 = arith.maximumf %347, %348 : vector<8x128xf32>
    %cst_67 = arith.constant 0.000000e+00 : f32
    %350 = vector.broadcast %cst_67 : f32 to vector<8x128xf32>
    %351 = arith.subf %350, %349 : vector<8x128xf32>
    %352 = math.exp %351 : vector<8x128xf32>
    %cst_68 = arith.constant 1.000000e+00 : f32
    %353 = vector.broadcast %cst_68 : f32 to vector<8x128xf32>
    %354 = arith.addf %353, %352 : vector<8x128xf32>
    %355 = tpu.reciprocal %354 {approx = true} : vector<8x128xf32> -> vector<8x128xf32>
    %356 = arith.mulf %354, %355 : vector<8x128xf32>
    %cst_69 = arith.constant 2.000000e+00 : f32
    %357 = vector.broadcast %cst_69 : f32 to vector<8x128xf32>
    %358 = arith.subf %357, %356 : vector<8x128xf32>
    %359 = arith.mulf %355, %358 : vector<8x128xf32>
    %c0_i32_70 = arith.constant 0 : i32
    %360 = arith.addi %124, %c0_i32_70 : i32
    %361 = arith.index_cast %360 : i32 to index
    %c0_71 = arith.constant 0 : index
    %c0_72 = arith.constant 0 : index
    %362 = vector.load %arg2[%361, %c0_71, %c0_72] : memref<8x8x128xf32, #tpu.memory_space<vmem>>, vector<1x8x128xf32>
    %363 = vector.shape_cast %362 : vector<1x8x128xf32> to vector<8x128xf32>
    %364 = arith.mulf %363, %359 : vector<8x128xf32>
    %c0_i32_73 = arith.constant 0 : i32
    %365 = arith.addi %124, %c0_i32_73 : i32
    %366 = arith.index_cast %365 : i32 to index
    %c0_74 = arith.constant 0 : index
    %c0_75 = arith.constant 0 : index
    %367 = vector.load %arg3[%366, %c0_74, %c0_75] : memref<8x8x128xf32, #tpu.memory_space<vmem>>, vector<1x8x128xf32>
    %368 = vector.shape_cast %367 : vector<1x8x128xf32> to vector<8x128xf32>
    %369 = vector.shape_cast %364 : vector<8x128xf32> to vector<1x8x128xf32>
    tpu.vector_store %arg3[%366, %c0_74, %c0_75], %369 {strides = array<i32>} : memref<8x8x128xf32, #tpu.memory_space<vmem>>, vector<1x8x128xf32>,
    %c1_i32_76 = arith.constant 1 : i32
    %370 = arith.addi %124, %c1_i32_76 : i32
    %371 = arith.index_cast %370 : i32 to index
    %c0_77 = arith.constant 0 : index
    %c0_78 = arith.constant 0 : index
    %372 = vector.load %arg2[%371, %c0_77, %c0_78] : memref<8x8x128xf32, #tpu.memory_space<vmem>>, vector<1x8x128xf32>
    %373 = vector.shape_cast %372 : vector<1x8x128xf32> to vector<8x128xf32>
    %374 = arith.mulf %373, %359 : vector<8x128xf32>
    %c1_i32_79 = arith.constant 1 : i32
    %375 = arith.addi %124, %c1_i32_79 : i32
    %376 = arith.index_cast %375 : i32 to index
    %c0_80 = arith.constant 0 : index
    %c0_81 = arith.constant 0 : index
    %377 = vector.load %arg3[%376, %c0_80, %c0_81] : memref<8x8x128xf32, #tpu.memory_space<vmem>>, vector<1x8x128xf32>
    %378 = vector.shape_cast %377 : vector<1x8x128xf32> to vector<8x128xf32>
    %379 = vector.shape_cast %374 : vector<8x128xf32> to vector<1x8x128xf32>
    tpu.vector_store %arg3[%376, %c0_80, %c0_81], %379 {strides = array<i32>} : memref<8x8x128xf32, #tpu.memory_space<vmem>>, vector<1x8x128xf32>,
    %c2_i32_82 = arith.constant 2 : i32
    %380 = arith.addi %124, %c2_i32_82 : i32
    %381 = arith.index_cast %380 : i32 to index
    %c0_83 = arith.constant 0 : index
    %c0_84 = arith.constant 0 : index
    %382 = vector.load %arg2[%381, %c0_83, %c0_84] : memref<8x8x128xf32, #tpu.memory_space<vmem>>, vector<1x8x128xf32>
    %383 = vector.shape_cast %382 : vector<1x8x128xf32> to vector<8x128xf32>
    %384 = arith.mulf %383, %359 : vector<8x128xf32>
    %c2_i32_85 = arith.constant 2 : i32
    %385 = arith.addi %124, %c2_i32_85 : i32
    %386 = arith.index_cast %385 : i32 to index
    %c0_86 = arith.constant 0 : index
    %c0_87 = arith.constant 0 : index
    %387 = vector.load %arg3[%386, %c0_86, %c0_87] : memref<8x8x128xf32, #tpu.memory_space<vmem>>, vector<1x8x128xf32>
    %388 = vector.shape_cast %387 : vector<1x8x128xf32> to vector<8x128xf32>
    %389 = vector.shape_cast %384 : vector<8x128xf32> to vector<1x8x128xf32>
    tpu.vector_store %arg3[%386, %c0_86, %c0_87], %389 {strides = array<i32>} : memref<8x8x128xf32, #tpu.memory_space<vmem>>, vector<1x8x128xf32>,
    %c3_i32_88 = arith.constant 3 : i32
    %390 = arith.addi %124, %c3_i32_88 : i32
    %391 = arith.index_cast %390 : i32 to index
    %c0_89 = arith.constant 0 : index
    %c0_90 = arith.constant 0 : index
    %392 = vector.load %arg2[%391, %c0_89, %c0_90] : memref<8x8x128xf32, #tpu.memory_space<vmem>>, vector<1x8x128xf32>
    %393 = vector.shape_cast %392 : vector<1x8x128xf32> to vector<8x128xf32>
    %394 = arith.mulf %393, %359 : vector<8x128xf32>
    %c3_i32_91 = arith.constant 3 : i32
    %395 = arith.addi %124, %c3_i32_91 : i32
    %396 = arith.index_cast %395 : i32 to index
    %c0_92 = arith.constant 0 : index
    %c0_93 = arith.constant 0 : index
    %397 = vector.load %arg3[%396, %c0_92, %c0_93] : memref<8x8x128xf32, #tpu.memory_space<vmem>>, vector<1x8x128xf32>
    %398 = vector.shape_cast %397 : vector<1x8x128xf32> to vector<8x128xf32>
    %399 = vector.shape_cast %394 : vector<8x128xf32> to vector<1x8x128xf32>
    tpu.vector_store %arg3[%396, %c0_92, %c0_93], %399 {strides = array<i32>} : memref<8x8x128xf32, #tpu.memory_space<vmem>>, vector<1x8x128xf32>,
    %c1_i32_94 = arith.constant 1 : i32
    %c4_i32_95 = arith.constant 4 : i32
    %400 = arith.muli %c1_i32_94, %c4_i32_95 : i32
    %c0_i32_96 = arith.constant 0 : i32
    %401 = arith.addi %400, %c0_i32_96 : i32
    %402 = arith.index_cast %401 : i32 to index
    %c0_97 = arith.constant 0 : index
    %c0_98 = arith.constant 0 : index
    %403 = vector.load %arg2[%402, %c0_97, %c0_98] : memref<8x8x128xf32, #tpu.memory_space<vmem>>, vector<1x8x128xf32>
    %404 = vector.shape_cast %403 : vector<1x8x128xf32> to vector<8x128xf32>
    %c1_i32_99 = arith.constant 1 : i32
    %405 = arith.addi %400, %c1_i32_99 : i32
    %406 = arith.index_cast %405 : i32 to index
    %c0_100 = arith.constant 0 : index
    %c0_101 = arith.constant 0 : index
    %407 = vector.load %arg2[%406, %c0_100, %c0_101] : memref<8x8x128xf32, #tpu.memory_space<vmem>>, vector<1x8x128xf32>
    %408 = vector.shape_cast %407 : vector<1x8x128xf32> to vector<8x128xf32>
    %c2_i32_102 = arith.constant 2 : i32
    %409 = arith.addi %400, %c2_i32_102 : i32
    %410 = arith.index_cast %409 : i32 to index
    %c0_103 = arith.constant 0 : index
    %c0_104 = arith.constant 0 : index
    %411 = vector.load %arg2[%410, %c0_103, %c0_104] : memref<8x8x128xf32, #tpu.memory_space<vmem>>, vector<1x8x128xf32>
    %412 = vector.shape_cast %411 : vector<1x8x128xf32> to vector<8x128xf32>
    %413 = arith.maximumf %404, %412 : vector<8x128xf32>
    %414 = arith.addf %404, %412 : vector<8x128xf32>
    %c3_i32_105 = arith.constant 3 : i32
    %415 = arith.addi %400, %c3_i32_105 : i32
    %416 = arith.index_cast %415 : i32 to index
    %c0_106 = arith.constant 0 : index
    %c0_107 = arith.constant 0 : index
    %417 = vector.load %arg2[%416, %c0_106, %c0_107] : memref<8x8x128xf32, #tpu.memory_space<vmem>>, vector<1x8x128xf32>
    %418 = vector.shape_cast %417 : vector<1x8x128xf32> to vector<8x128xf32>
    %419 = arith.maximumf %408, %418 : vector<8x128xf32>
    %420 = arith.addf %408, %418 : vector<8x128xf32>
    %421 = arith.maximumf %413, %419 : vector<8x128xf32>
    %422 = arith.addf %414, %420 : vector<8x128xf32>
    %cst_108 = arith.constant 0.000000e+00 : f32
    %423 = vector.broadcast %cst_108 : f32 to vector<8x128xf32>
    %cst_109 = arith.constant 0.000000e+00 : f32
    %424 = vector.broadcast %cst_109 : f32 to vector<8x128xf32>
    %c2_i32_110 = arith.constant 2 : i32
    %425 = tpu.dynamic_rotate %421 by %c2_i32_110 dim 1 : vector<8x128xf32>, i32 -> vector<8x128xf32>
    %cst_111 = arith.constant 0.000000e+00 : f32
    %426 = vector.broadcast %cst_111 : f32 to vector<8x128xf32>
    %427 = arith.select %69, %425, %426 : vector<8x128xi1>, vector<8x128xf32>
    %c1_i32_112 = arith.constant 1 : i32
    %428 = tpu.dynamic_rotate %421 by %c1_i32_112 dim 1 : vector<8x128xf32>, i32 -> vector<8x128xf32>
    %cst_113 = arith.constant 0.000000e+00 : f32
    %429 = vector.broadcast %cst_113 : f32 to vector<8x128xf32>
    %430 = arith.select %87, %428, %429 : vector<8x128xi1>, vector<8x128xf32>
    %c127_i32_114 = arith.constant 127 : i32
    %431 = tpu.dynamic_rotate %421 by %c127_i32_114 dim 1 : vector<8x128xf32>, i32 -> vector<8x128xf32>
    %cst_115 = arith.constant 0.000000e+00 : f32
    %432 = vector.broadcast %cst_115 : f32 to vector<8x128xf32>
    %433 = arith.select %105, %431, %432 : vector<8x128xi1>, vector<8x128xf32>
    %c126_i32_116 = arith.constant 126 : i32
    %434 = tpu.dynamic_rotate %421 by %c126_i32_116 dim 1 : vector<8x128xf32>, i32 -> vector<8x128xf32>
    %cst_117 = arith.constant 0.000000e+00 : f32
    %435 = vector.broadcast %cst_117 : f32 to vector<8x128xf32>
    %436 = arith.select %123, %434, %435 : vector<8x128xi1>, vector<8x128xf32>
    %437 = vector.broadcast %0 : f32 to vector<8x128xf32>
    %438 = arith.mulf %437, %427 : vector<8x128xf32>
    %439 = vector.broadcast %1 : f32 to vector<8x128xf32>
    %440 = arith.mulf %439, %430 : vector<8x128xf32>
    %441 = arith.addf %438, %440 : vector<8x128xf32>
    %442 = vector.broadcast %2 : f32 to vector<8x128xf32>
    %443 = arith.mulf %442, %421 : vector<8x128xf32>
    %444 = vector.broadcast %3 : f32 to vector<8x128xf32>
    %445 = arith.mulf %444, %433 : vector<8x128xf32>
    %446 = arith.addf %443, %445 : vector<8x128xf32>
    %447 = arith.addf %441, %446 : vector<8x128xf32>
    %448 = vector.broadcast %4 : f32 to vector<8x128xf32>
    %449 = arith.mulf %448, %436 : vector<8x128xf32>
    %450 = arith.addf %447, %449 : vector<8x128xf32>
    %c2_i32_118 = arith.constant 2 : i32
    %451 = tpu.dynamic_rotate %450 by %c2_i32_118 dim 0 : vector<8x128xf32>, i32 -> vector<8x128xf32>
    %cst_119 = arith.constant 0.000000e+00 : f32
    %452 = vector.broadcast %cst_119 : f32 to vector<8x128xf32>
    %453 = arith.select %60, %451, %452 : vector<8x128xi1>, vector<8x128xf32>
    %454 = arith.addf %423, %453 : vector<8x128xf32>
    %455 = vector.broadcast %5 : f32 to vector<8x128xf32>
    %456 = arith.mulf %455, %427 : vector<8x128xf32>
    %457 = vector.broadcast %6 : f32 to vector<8x128xf32>
    %458 = arith.mulf %457, %430 : vector<8x128xf32>
    %459 = arith.addf %456, %458 : vector<8x128xf32>
    %460 = vector.broadcast %7 : f32 to vector<8x128xf32>
    %461 = arith.mulf %460, %421 : vector<8x128xf32>
    %462 = vector.broadcast %8 : f32 to vector<8x128xf32>
    %463 = arith.mulf %462, %433 : vector<8x128xf32>
    %464 = arith.addf %461, %463 : vector<8x128xf32>
    %465 = arith.addf %459, %464 : vector<8x128xf32>
    %466 = vector.broadcast %9 : f32 to vector<8x128xf32>
    %467 = arith.mulf %466, %436 : vector<8x128xf32>
    %468 = arith.addf %465, %467 : vector<8x128xf32>
    %c1_i32_120 = arith.constant 1 : i32
    %469 = tpu.dynamic_rotate %468 by %c1_i32_120 dim 0 : vector<8x128xf32>, i32 -> vector<8x128xf32>
    %cst_121 = arith.constant 0.000000e+00 : f32
    %470 = vector.broadcast %cst_121 : f32 to vector<8x128xf32>
    %471 = arith.select %78, %469, %470 : vector<8x128xi1>, vector<8x128xf32>
    %472 = arith.addf %424, %471 : vector<8x128xf32>
    %473 = vector.broadcast %10 : f32 to vector<8x128xf32>
    %474 = arith.mulf %473, %427 : vector<8x128xf32>
    %475 = vector.broadcast %11 : f32 to vector<8x128xf32>
    %476 = arith.mulf %475, %430 : vector<8x128xf32>
    %477 = arith.addf %474, %476 : vector<8x128xf32>
    %478 = vector.broadcast %12 : f32 to vector<8x128xf32>
    %479 = arith.mulf %478, %421 : vector<8x128xf32>
    %480 = vector.broadcast %13 : f32 to vector<8x128xf32>
    %481 = arith.mulf %480, %433 : vector<8x128xf32>
    %482 = arith.addf %479, %481 : vector<8x128xf32>
    %483 = arith.addf %477, %482 : vector<8x128xf32>
    %484 = vector.broadcast %14 : f32 to vector<8x128xf32>
    %485 = arith.mulf %484, %436 : vector<8x128xf32>
    %486 = arith.addf %483, %485 : vector<8x128xf32>
    %487 = arith.addf %454, %486 : vector<8x128xf32>
    %488 = vector.broadcast %15 : f32 to vector<8x128xf32>
    %489 = arith.mulf %488, %427 : vector<8x128xf32>
    %490 = vector.broadcast %16 : f32 to vector<8x128xf32>
    %491 = arith.mulf %490, %430 : vector<8x128xf32>
    %492 = arith.addf %489, %491 : vector<8x128xf32>
    %493 = vector.broadcast %17 : f32 to vector<8x128xf32>
    %494 = arith.mulf %493, %421 : vector<8x128xf32>
    %495 = vector.broadcast %18 : f32 to vector<8x128xf32>
    %496 = arith.mulf %495, %433 : vector<8x128xf32>
    %497 = arith.addf %494, %496 : vector<8x128xf32>
    %498 = arith.addf %492, %497 : vector<8x128xf32>
    %499 = vector.broadcast %19 : f32 to vector<8x128xf32>
    %500 = arith.mulf %499, %436 : vector<8x128xf32>
    %501 = arith.addf %498, %500 : vector<8x128xf32>
    %c7_i32_122 = arith.constant 7 : i32
    %502 = tpu.dynamic_rotate %501 by %c7_i32_122 dim 0 : vector<8x128xf32>, i32 -> vector<8x128xf32>
    %cst_123 = arith.constant 0.000000e+00 : f32
    %503 = vector.broadcast %cst_123 : f32 to vector<8x128xf32>
    %504 = arith.select %96, %502, %503 : vector<8x128xi1>, vector<8x128xf32>
    %505 = arith.addf %472, %504 : vector<8x128xf32>
    %506 = vector.broadcast %20 : f32 to vector<8x128xf32>
    %507 = arith.mulf %506, %427 : vector<8x128xf32>
    %508 = vector.broadcast %21 : f32 to vector<8x128xf32>
    %509 = arith.mulf %508, %430 : vector<8x128xf32>
    %510 = arith.addf %507, %509 : vector<8x128xf32>
    %511 = vector.broadcast %22 : f32 to vector<8x128xf32>
    %512 = arith.mulf %511, %421 : vector<8x128xf32>
    %513 = vector.broadcast %23 : f32 to vector<8x128xf32>
    %514 = arith.mulf %513, %433 : vector<8x128xf32>
    %515 = arith.addf %512, %514 : vector<8x128xf32>
    %516 = arith.addf %510, %515 : vector<8x128xf32>
    %517 = vector.broadcast %24 : f32 to vector<8x128xf32>
    %518 = arith.mulf %517, %436 : vector<8x128xf32>
    %519 = arith.addf %516, %518 : vector<8x128xf32>
    %c6_i32_124 = arith.constant 6 : i32
    %520 = tpu.dynamic_rotate %519 by %c6_i32_124 dim 0 : vector<8x128xf32>, i32 -> vector<8x128xf32>
    %cst_125 = arith.constant 0.000000e+00 : f32
    %521 = vector.broadcast %cst_125 : f32 to vector<8x128xf32>
    %522 = arith.select %114, %520, %521 : vector<8x128xi1>, vector<8x128xf32>
    %523 = arith.addf %487, %522 : vector<8x128xf32>
    %c2_i32_126 = arith.constant 2 : i32
    %524 = tpu.dynamic_rotate %422 by %c2_i32_126 dim 1 : vector<8x128xf32>, i32 -> vector<8x128xf32>
    %cst_127 = arith.constant 0.000000e+00 : f32
    %525 = vector.broadcast %cst_127 : f32 to vector<8x128xf32>
    %526 = arith.select %69, %524, %525 : vector<8x128xi1>, vector<8x128xf32>
    %c1_i32_128 = arith.constant 1 : i32
    %527 = tpu.dynamic_rotate %422 by %c1_i32_128 dim 1 : vector<8x128xf32>, i32 -> vector<8x128xf32>
    %cst_129 = arith.constant 0.000000e+00 : f32
    %528 = vector.broadcast %cst_129 : f32 to vector<8x128xf32>
    %529 = arith.select %87, %527, %528 : vector<8x128xi1>, vector<8x128xf32>
    %c127_i32_130 = arith.constant 127 : i32
    %530 = tpu.dynamic_rotate %422 by %c127_i32_130 dim 1 : vector<8x128xf32>, i32 -> vector<8x128xf32>
    %cst_131 = arith.constant 0.000000e+00 : f32
    %531 = vector.broadcast %cst_131 : f32 to vector<8x128xf32>
    %532 = arith.select %105, %530, %531 : vector<8x128xi1>, vector<8x128xf32>
    %c126_i32_132 = arith.constant 126 : i32
    %533 = tpu.dynamic_rotate %422 by %c126_i32_132 dim 1 : vector<8x128xf32>, i32 -> vector<8x128xf32>
    %cst_133 = arith.constant 0.000000e+00 : f32
    %534 = vector.broadcast %cst_133 : f32 to vector<8x128xf32>
    %535 = arith.select %123, %533, %534 : vector<8x128xi1>, vector<8x128xf32>
    %536 = vector.broadcast %25 : f32 to vector<8x128xf32>
    %537 = arith.mulf %536, %526 : vector<8x128xf32>
    %538 = vector.broadcast %26 : f32 to vector<8x128xf32>
    %539 = arith.mulf %538, %529 : vector<8x128xf32>
    %540 = arith.addf %537, %539 : vector<8x128xf32>
    %541 = vector.broadcast %27 : f32 to vector<8x128xf32>
    %542 = arith.mulf %541, %422 : vector<8x128xf32>
    %543 = vector.broadcast %28 : f32 to vector<8x128xf32>
    %544 = arith.mulf %543, %532 : vector<8x128xf32>
    %545 = arith.addf %542, %544 : vector<8x128xf32>
    %546 = arith.addf %540, %545 : vector<8x128xf32>
    %547 = vector.broadcast %29 : f32 to vector<8x128xf32>
    %548 = arith.mulf %547, %535 : vector<8x128xf32>
    %549 = arith.addf %546, %548 : vector<8x128xf32>
    %c2_i32_134 = arith.constant 2 : i32
    %550 = tpu.dynamic_rotate %549 by %c2_i32_134 dim 0 : vector<8x128xf32>, i32 -> vector<8x128xf32>
    %cst_135 = arith.constant 0.000000e+00 : f32
    %551 = vector.broadcast %cst_135 : f32 to vector<8x128xf32>
    %552 = arith.select %60, %550, %551 : vector<8x128xi1>, vector<8x128xf32>
    %553 = arith.addf %523, %552 : vector<8x128xf32>
    %554 = vector.broadcast %30 : f32 to vector<8x128xf32>
    %555 = arith.mulf %554, %526 : vector<8x128xf32>
    %556 = vector.broadcast %31 : f32 to vector<8x128xf32>
    %557 = arith.mulf %556, %529 : vector<8x128xf32>
    %558 = arith.addf %555, %557 : vector<8x128xf32>
    %559 = vector.broadcast %32 : f32 to vector<8x128xf32>
    %560 = arith.mulf %559, %422 : vector<8x128xf32>
    %561 = vector.broadcast %33 : f32 to vector<8x128xf32>
    %562 = arith.mulf %561, %532 : vector<8x128xf32>
    %563 = arith.addf %560, %562 : vector<8x128xf32>
    %564 = arith.addf %558, %563 : vector<8x128xf32>
    %565 = vector.broadcast %34 : f32 to vector<8x128xf32>
    %566 = arith.mulf %565, %535 : vector<8x128xf32>
    %567 = arith.addf %564, %566 : vector<8x128xf32>
    %c1_i32_136 = arith.constant 1 : i32
    %568 = tpu.dynamic_rotate %567 by %c1_i32_136 dim 0 : vector<8x128xf32>, i32 -> vector<8x128xf32>
    %cst_137 = arith.constant 0.000000e+00 : f32
    %569 = vector.broadcast %cst_137 : f32 to vector<8x128xf32>
    %570 = arith.select %78, %568, %569 : vector<8x128xi1>, vector<8x128xf32>
    %571 = arith.addf %505, %570 : vector<8x128xf32>
    %572 = vector.broadcast %35 : f32 to vector<8x128xf32>
    %573 = arith.mulf %572, %526 : vector<8x128xf32>
    %574 = vector.broadcast %36 : f32 to vector<8x128xf32>
    %575 = arith.mulf %574, %529 : vector<8x128xf32>
    %576 = arith.addf %573, %575 : vector<8x128xf32>
    %577 = vector.broadcast %37 : f32 to vector<8x128xf32>
    %578 = arith.mulf %577, %422 : vector<8x128xf32>
    %579 = vector.broadcast %38 : f32 to vector<8x128xf32>
    %580 = arith.mulf %579, %532 : vector<8x128xf32>
    %581 = arith.addf %578, %580 : vector<8x128xf32>
    %582 = arith.addf %576, %581 : vector<8x128xf32>
    %583 = vector.broadcast %39 : f32 to vector<8x128xf32>
    %584 = arith.mulf %583, %535 : vector<8x128xf32>
    %585 = arith.addf %582, %584 : vector<8x128xf32>
    %586 = arith.addf %553, %585 : vector<8x128xf32>
    %587 = vector.broadcast %40 : f32 to vector<8x128xf32>
    %588 = arith.mulf %587, %526 : vector<8x128xf32>
    %589 = vector.broadcast %41 : f32 to vector<8x128xf32>
    %590 = arith.mulf %589, %529 : vector<8x128xf32>
    %591 = arith.addf %588, %590 : vector<8x128xf32>
    %592 = vector.broadcast %42 : f32 to vector<8x128xf32>
    %593 = arith.mulf %592, %422 : vector<8x128xf32>
    %594 = vector.broadcast %43 : f32 to vector<8x128xf32>
    %595 = arith.mulf %594, %532 : vector<8x128xf32>
    %596 = arith.addf %593, %595 : vector<8x128xf32>
    %597 = arith.addf %591, %596 : vector<8x128xf32>
    %598 = vector.broadcast %44 : f32 to vector<8x128xf32>
    %599 = arith.mulf %598, %535 : vector<8x128xf32>
    %600 = arith.addf %597, %599 : vector<8x128xf32>
    %c7_i32_138 = arith.constant 7 : i32
    %601 = tpu.dynamic_rotate %600 by %c7_i32_138 dim 0 : vector<8x128xf32>, i32 -> vector<8x128xf32>
    %cst_139 = arith.constant 0.000000e+00 : f32
    %602 = vector.broadcast %cst_139 : f32 to vector<8x128xf32>
    %603 = arith.select %96, %601, %602 : vector<8x128xi1>, vector<8x128xf32>
    %604 = arith.addf %571, %603 : vector<8x128xf32>
    %605 = vector.broadcast %45 : f32 to vector<8x128xf32>
    %606 = arith.mulf %605, %526 : vector<8x128xf32>
    %607 = vector.broadcast %46 : f32 to vector<8x128xf32>
    %608 = arith.mulf %607, %529 : vector<8x128xf32>
    %609 = arith.addf %606, %608 : vector<8x128xf32>
    %610 = vector.broadcast %47 : f32 to vector<8x128xf32>
    %611 = arith.mulf %610, %422 : vector<8x128xf32>
    %612 = vector.broadcast %48 : f32 to vector<8x128xf32>
    %613 = arith.mulf %612, %532 : vector<8x128xf32>
    %614 = arith.addf %611, %613 : vector<8x128xf32>
    %615 = arith.addf %609, %614 : vector<8x128xf32>
    %616 = vector.broadcast %49 : f32 to vector<8x128xf32>
    %617 = arith.mulf %616, %535 : vector<8x128xf32>
    %618 = arith.addf %615, %617 : vector<8x128xf32>
    %c6_i32_140 = arith.constant 6 : i32
    %619 = tpu.dynamic_rotate %618 by %c6_i32_140 dim 0 : vector<8x128xf32>, i32 -> vector<8x128xf32>
    %cst_141 = arith.constant 0.000000e+00 : f32
    %620 = vector.broadcast %cst_141 : f32 to vector<8x128xf32>
    %621 = arith.select %114, %619, %620 : vector<8x128xi1>, vector<8x128xf32>
    %622 = arith.addf %586, %621 : vector<8x128xf32>
    %623 = arith.addf %622, %604 : vector<8x128xf32>
    %cst_142 = arith.constant -6.000000e+01 : f32
    %624 = vector.broadcast %cst_142 : f32 to vector<8x128xf32>
    %625 = arith.maximumf %623, %624 : vector<8x128xf32>
    %cst_143 = arith.constant 0.000000e+00 : f32
    %626 = vector.broadcast %cst_143 : f32 to vector<8x128xf32>
    %627 = arith.subf %626, %625 : vector<8x128xf32>
    %628 = math.exp %627 : vector<8x128xf32>
    %cst_144 = arith.constant 1.000000e+00 : f32
    %629 = vector.broadcast %cst_144 : f32 to vector<8x128xf32>
    %630 = arith.addf %629, %628 : vector<8x128xf32>
    %631 = tpu.reciprocal %630 {approx = true} : vector<8x128xf32> -> vector<8x128xf32>
    %632 = arith.mulf %630, %631 : vector<8x128xf32>
    %cst_145 = arith.constant 2.000000e+00 : f32
    %633 = vector.broadcast %cst_145 : f32 to vector<8x128xf32>
    %634 = arith.subf %633, %632 : vector<8x128xf32>
    %635 = arith.mulf %631, %634 : vector<8x128xf32>
    %c0_i32_146 = arith.constant 0 : i32
    %636 = arith.addi %400, %c0_i32_146 : i32
    %637 = arith.index_cast %636 : i32 to index
    %c0_147 = arith.constant 0 : index
    %c0_148 = arith.constant 0 : index
    %638 = vector.load %arg2[%637, %c0_147, %c0_148] : memref<8x8x128xf32, #tpu.memory_space<vmem>>, vector<1x8x128xf32>
    %639 = vector.shape_cast %638 : vector<1x8x128xf32> to vector<8x128xf32>
    %640 = arith.mulf %639, %635 : vector<8x128xf32>
    %c0_i32_149 = arith.constant 0 : i32
    %641 = arith.addi %400, %c0_i32_149 : i32
    %642 = arith.index_cast %641 : i32 to index
    %c0_150 = arith.constant 0 : index
    %c0_151 = arith.constant 0 : index
    %643 = vector.load %arg3[%642, %c0_150, %c0_151] : memref<8x8x128xf32, #tpu.memory_space<vmem>>, vector<1x8x128xf32>
    %644 = vector.shape_cast %643 : vector<1x8x128xf32> to vector<8x128xf32>
    %645 = vector.shape_cast %640 : vector<8x128xf32> to vector<1x8x128xf32>
    tpu.vector_store %arg3[%642, %c0_150, %c0_151], %645 {strides = array<i32>} : memref<8x8x128xf32, #tpu.memory_space<vmem>>, vector<1x8x128xf32>,
    %c1_i32_152 = arith.constant 1 : i32
    %646 = arith.addi %400, %c1_i32_152 : i32
    %647 = arith.index_cast %646 : i32 to index
    %c0_153 = arith.constant 0 : index
    %c0_154 = arith.constant 0 : index
    %648 = vector.load %arg2[%647, %c0_153, %c0_154] : memref<8x8x128xf32, #tpu.memory_space<vmem>>, vector<1x8x128xf32>
    %649 = vector.shape_cast %648 : vector<1x8x128xf32> to vector<8x128xf32>
    %650 = arith.mulf %649, %635 : vector<8x128xf32>
    %c1_i32_155 = arith.constant 1 : i32
    %651 = arith.addi %400, %c1_i32_155 : i32
    %652 = arith.index_cast %651 : i32 to index
    %c0_156 = arith.constant 0 : index
    %c0_157 = arith.constant 0 : index
    %653 = vector.load %arg3[%652, %c0_156, %c0_157] : memref<8x8x128xf32, #tpu.memory_space<vmem>>, vector<1x8x128xf32>
    %654 = vector.shape_cast %653 : vector<1x8x128xf32> to vector<8x128xf32>
    %655 = vector.shape_cast %650 : vector<8x128xf32> to vector<1x8x128xf32>
    tpu.vector_store %arg3[%652, %c0_156, %c0_157], %655 {strides = array<i32>} : memref<8x8x128xf32, #tpu.memory_space<vmem>>, vector<1x8x128xf32>,
    %c2_i32_158 = arith.constant 2 : i32
    %656 = arith.addi %400, %c2_i32_158 : i32
    %657 = arith.index_cast %656 : i32 to index
    %c0_159 = arith.constant 0 : index
    %c0_160 = arith.constant 0 : index
    %658 = vector.load %arg2[%657, %c0_159, %c0_160] : memref<8x8x128xf32, #tpu.memory_space<vmem>>, vector<1x8x128xf32>
    %659 = vector.shape_cast %658 : vector<1x8x128xf32> to vector<8x128xf32>
    %660 = arith.mulf %659, %635 : vector<8x128xf32>
    %c2_i32_161 = arith.constant 2 : i32
    %661 = arith.addi %400, %c2_i32_161 : i32
    %662 = arith.index_cast %661 : i32 to index
    %c0_162 = arith.constant 0 : index
    %c0_163 = arith.constant 0 : index
    %663 = vector.load %arg3[%662, %c0_162, %c0_163] : memref<8x8x128xf32, #tpu.memory_space<vmem>>, vector<1x8x128xf32>
    %664 = vector.shape_cast %663 : vector<1x8x128xf32> to vector<8x128xf32>
    %665 = vector.shape_cast %660 : vector<8x128xf32> to vector<1x8x128xf32>
    tpu.vector_store %arg3[%662, %c0_162, %c0_163], %665 {strides = array<i32>} : memref<8x8x128xf32, #tpu.memory_space<vmem>>, vector<1x8x128xf32>,
    %c3_i32_164 = arith.constant 3 : i32
    %666 = arith.addi %400, %c3_i32_164 : i32
    %667 = arith.index_cast %666 : i32 to index
    %c0_165 = arith.constant 0 : index
    %c0_166 = arith.constant 0 : index
    %668 = vector.load %arg2[%667, %c0_165, %c0_166] : memref<8x8x128xf32, #tpu.memory_space<vmem>>, vector<1x8x128xf32>
    %669 = vector.shape_cast %668 : vector<1x8x128xf32> to vector<8x128xf32>
    %670 = arith.mulf %669, %635 : vector<8x128xf32>
    %c3_i32_167 = arith.constant 3 : i32
    %671 = arith.addi %400, %c3_i32_167 : i32
    %672 = arith.index_cast %671 : i32 to index
    %c0_168 = arith.constant 0 : index
    %c0_169 = arith.constant 0 : index
    %673 = vector.load %arg3[%672, %c0_168, %c0_169] : memref<8x8x128xf32, #tpu.memory_space<vmem>>, vector<1x8x128xf32>
    %674 = vector.shape_cast %673 : vector<1x8x128xf32> to vector<8x128xf32>
    %675 = vector.shape_cast %670 : vector<8x128xf32> to vector<1x8x128xf32>
    tpu.vector_store %arg3[%672, %c0_168, %c0_169], %675 {strides = array<i32>} : memref<8x8x128xf32, #tpu.memory_space<vmem>>, vector<1x8x128xf32>,
    %c2_i32_170 = arith.constant 2 : i32
    return
  }
  func.func @transform_0(%arg0: i32) -> i32 {
    %c0_i32 = arith.constant 0 : i32
    %c0_i32_0 = arith.constant 0 : i32
    return %c0_i32 : i32
  }
  func.func @transform_1(%arg0: i32) -> (i32, i32, i32) {
    %c0_i32 = arith.constant 0 : i32
    %c0_i32_0 = arith.constant 0 : i32
    %c0_i32_1 = arith.constant 0 : i32
    return %arg0, %c0_i32, %c0_i32_0 : i32, i32, i32
  }
  func.func @transform_2(%arg0: i32) -> (i32, i32, i32) {
    %c0_i32 = arith.constant 0 : i32
    %c0_i32_0 = arith.constant 0 : i32
    %c0_i32_1 = arith.constant 0 : i32
    return %arg0, %c0_i32, %c0_i32_0 : i32, i32, i32
  }
}

</mosaic_0001>

<bundles_post_ra>
// kernel: tpu_custom_call.1
= control target key start
LH: loop header
LB: loop body
LE: loop exit
PB: predicated region body
PF: predicated region fallthrough
CT: control target
= control target key end

     0   :  { %s1854_s0 = inlined_call_operand.hbm [shape: f32[50], index: 0, kind: input, shape index: {}]   ;;  %s1855_s1 = inlined_call_operand.hbm [shape: f32[64,8,128], index: 1, kind: input, shape index: {}]   ;;  %s1856_s2 = inlined_call_operand.hbm [shape: f32[64,8,128], index: 2, kind: output, shape index: {}]  }
   0x1   :  { %1935 = sst [smem:[#allocation51_spill]] %s1854_s0 }
   0x2   :  { %1936 = sst [smem:[#allocation52_spill]] %s1855_s1 }
   0x3   :  { %1937 = sst [smem:[#allocation53_spill]] %s1856_s2 }
   0x4   :  { %7 = vsyncpa [#allocation5], 0 }
   0x5   :  { %8 = vsyncpa [#allocation3], 0 }
   0x6   :  { %10 = vsyncpa [#allocation3 + $0x1], 0 }
   0x7   :  { %11 = vsyncpa [#allocation4], 0 }
   0x8   :  { %13 = vsyncpa [#allocation4 + $0x1], 0  ;;  %s1062_s9 = smov 0   ;;  %s1064_s10 = smov 0  }
   0x9   :  { %s1066_s11 = smov 0   ;;  %s1068_s12 = smov 0  }
   0xa LB: > { %1938 = sst [smem:[#allocation11_spill]] %s1022_s9  ;;  %s1083_s13 = sadd.s32 4294967295, %s1034_s12   ;;  %s1034_s12 = sphi %s1068_s12, %s2098_s12   ;;  %s1030_s11 = sphi %s1066_s11, %s2101_s11   ;;  %s1026_s10 = sphi %s1064_s10, %s2100_s10   ;;  %s1022_s9 = sphi %s1062_s9, %s2099_s9  }
   0xb   : > { %1939 = sst [smem:[#allocation12_spill]] %s1026_s10  ;;  %s767_s14 = sadd.s32 4294967294, %s1034_s12  }
   0xc   : > { %1940 = sst [smem:[#allocation13_spill]] %s1030_s11  ;;  %s1087_s15 = sadd.s32 1, %s1034_s12  }
   0xd   : > { %1941 = sst [smem:[#allocation14_spill]] %s1034_s12  ;;  %s47_s16 = sadd.s32 1, %s1030_s11 }
   0xe   : > { %1942 = sst [smem:[#allocation15_spill]] %s1083_s13  ;;  %s44_s17 = ssub.s32 %s1034_s12, %s1087_s15 }
   0xf   : > { %1943 = sst [smem:[#allocation16_spill]] %s1087_s15  ;;  %p54_p0 = scmp.ne.s32.totalorder %s1030_s11, %s1026_s10 }
  0x10   : > { %p45_p1 = scmp.eq.s32.totalorder %s44_s17, 0  ;;  %p55_p2 = scmp.eq.s32.totalorder %s1034_s12, 0 }
  0x11   : > { %p60_p3 = scmp.ne.s32.totalorder %s1026_s10, %s1022_s9  ;;  %p1858_p4 = scmp.eq.s32.totalorder %s1083_s13, 0 }
  0x12   : > { %s1099_s18 = scalar_select %p45_p1, %s1030_s11, %s47_s16  }
  0x13   : > { %p1101_p5 = por %p55_p2, %p54_p0  ;;  %p1107_p6 = por %p1858_p4, %p60_p3 }
  0x14   : > { %1944 = sst [smem:[#allocation17_spill]] %s1099_s18  ;;  %p84_p7 = scmp.eq.s32.totalorder %s1083_s13, 7 }
  0x15   : > { %s1946_s20 = scalar_select %p1107_p6, 1, 0 }
  0x16   : > { %p90_p8 = scmp.eq.s32.totalorder %s767_s14, 7  ;;  %p768_p9 = scmp.ge.s32.totalorder %s1034_s12, 1 }
  0x17   : > { %p97_p10 = scmp.lt.s32.totalorder %s1034_s12, 9  ;;  %p1114_p11 = por %p84_p7, %p54_p0 }
  0x18   : > { %p1118_p12 = por %p90_p8, %p60_p3  ;;  %p875_p2 = scmp.lt.s32.totalorder %s1034_s12, 8 }
  0x19   : > { %s1947_s21 = scalar_select %p1114_p11, 1, 0 }
  0x1a   : > { %s1949_s22 = scalar_select %p1118_p12, 1, 0 }
  0x1b   : > { %1948 = sst [smem:[#allocation18_spill]] %s1947_s21  ;;  %p1122_p13 = pnand %p768_p9, %p97_p10 }
  0x1c   : > { %1950 = sst [smem:[#allocation19_spill]] %s1949_s22  ;;  %s119_s24 = sand.u32 1, %s1030_s11  }
  0x1d   : > { %s1951_s23 = scalar_select %p1122_p13, 1, 0 }
  0x1e   : > { %p862_p1 = pneg %p1122_p13  ;;  %s852_s25 = sshll.u32 %s1034_s12, 10 }
  0x1f   : > { %p1135_p0 = pnand %p875_p2, %p1101_p5  ;;  %s771_s27 = sshll.u32 %s119_s24, 6 }
  0x20   : > { %p863_p6 = pnand %p862_p1, %p1858_p4  ;;  %s1036_s28 = smov [#allocation2]  }
  0x21   : > { %s1953_s0 = sld [smem:[#allocation51_spill]]  ;;  %s123_s6 = scalar_lea.vmem [#allocation6], %s771_s27 }
  0x22   : > { %s1954_s1 = sld [smem:[#allocation52_spill]]  ;;  %s130_s7 = sshll.u32 %s123_s6, 4  ;;  %s1147_s7 = int_to_ptr.vmem [resolvable:$true] %s130_s7 }
  0x23   : > { %s1149_s8 = scalar_lea.sflag [#allocation3], %s119_s24  ;;  %p940_p5 = pneg %p1135_p0 }
  0x27   : > { %865 = dma.hbm_to_smem (!%p863_p6), %s1953_s0, 16, %s1036_s28, [#allocation5]  }
  0x28   : > { %s1145_s5 = scalar_lea.hbm %s1954_s1, %s852_s25  ;;  %s943_s19 = scalar_lea.hbm %s1954_s1, 8192 }
  0x29   : > { %s938_s14 = scalar_lea.hbm %s1145_s5, 1024  ;;  %p944_p8 = scmp.lt.s32.totalorder %s1145_s5, %s1954_s1 }
  0x2a   : > { %p939_p3 = scmp.ne.s32.totalorder %s1145_s5, %s938_s14  ;;  %p945_p9 = scmp.lt.s32.totalorder %s943_s19, %s938_s14 }
  0x2c   : > { %p941_p7 = pnand %p940_p5, %p939_p3  ;;  %p946_p10 = por %p945_p9, %p944_p8 }
  0x2e   : > { %p942_p6 = pneg %p941_p7 }
  0x30   : > { %p947_p1 = pnand %p946_p10, %p942_p6 }
  0x32   : > { %950 = shalt.err (!%p947_p1)
}
  0x33   : > { %s951_s24 = scalar_lea.vmem %s1147_s7, 1024  ;;  %s1037_s27 = smov [#allocation6]  }
  0x34   : > { %p952_p2 = scmp.ne.s32.totalorder %s1147_s7, %s951_s24  ;;  %s956_s29 = sshll.u32 %s1037_s27, 4  ;;  %s957_s29 = int_to_ptr.vmem [resolvable:$false] %s956_s29 }
  0x35   : > { %s958_s30 = scalar_lea.vmem %s957_s29, 2048  ;;  %p959_p7 = scmp.lt.s32.totalorder %s1147_s7, %s957_s29 }
  0x36   : > { %p954_p4 = pnand %p952_p2, %p940_p5  ;;  %p960_p12 = scmp.lt.s32.totalorder %s958_s30, %s951_s24 }
  0x38   : > { %p955_p3 = pneg %p954_p4  ;;  %p961_p11 = por %p960_p12, %p959_p7 }
  0x3a   : > { %p962_p13 = pnand %p961_p11, %p955_p3 }
  0x3c   : > { %965 = shalt.err (!%p962_p13)
}
  0x3d   : > { %s1038_s3 = smov 128   ;;  %s1039_s4 = smov 8  }
  0x3e   : > { %869 = dma.hbm_to_vmem [thread:$0]  (!%p1135_p0), %s1145_s5, 1024, %s1147_s7, %s1149_s8, %s1038_s3, %s1038_s3, %s1039_s4  }
  0x3f   : > { %p1955_p5 = scmp.ne.s32.totalorder %s1951_s23, 0 }
  0x41   : > { %142 = sbr.rel (%p1955_p5) target bundleno = 337 (0x151), region = 28 }
  0x46   : > { %p1956_p4 = scmp.eq.s32.totalorder %s1083_s13, 0 }
  0x48   : > { %1009 = dma.done.wait (%p1956_p4), [#allocation5], 16   ;;  %p1957_p6 = pmov %p1956_p4 }
  0x49   : > { %s1177_s6 = sand.u32 1, %s1026_s10   ;;  %p1959_p11 = scmp.ne.s32.totalorder %s1946_s20, 0 }
  0x4a   : > { %1011 = vsyncadd (%p1957_p6), [#allocation5], 4294967280  ;;  %1958 = sst [smem:[#allocation20_spill]] %s1177_s6  ;;  %s1861_s14 = sshll.u32 %s1177_s6, 6 }
  0x4b   : > { %s149_s16 = scalar_lea.sflag [#allocation3], %s1177_s6  ;;  %s152_s26 = scalar_lea.vmem [#allocation6], %s1861_s14 }
  0x4c   : > { %1013 = dma.done.wait (%p1959_p11), %s149_s16, 1024  }
  0x4d   : > { %1015 = vsyncadd (%p1959_p11), %s149_s16, 4294966272 }
  0x4e   : > { %157 = sfence }
  0x4f   : > { %v1187_v0 = vld [vmem:[%s152_s26] sm:$0xff]  ;;  %v1189_v1 = vld [vmem:[%s152_s26 + $0x8] sm:$0xff]  ;;  %v1191_v2 = vld [vmem:[%s152_s26 + $0x10] sm:$0xff]  ;;  %s1040_s20 = smov 127   ;;  %s1041_s23 = smov 2   ;;  %v226_v20 = vlaneseq }
  0x50   : > { %1960 = vst [vmem:[#allocation21_spill] sm:$0xff] %v1187_v0  ;;  %1961 = vst [vmem:[#allocation22_spill] sm:$0xff] %v1189_v1  ;;  %v267_v3 = vmax.f32 %v1187_v0, %v1191_v2  ;;  %v1195_v4 = vld [vmem:[%s152_s26 + $0x18] sm:$0xff]  ;;  %v1197_v5 = vld [vmem:[%s152_s26 + $0x20] sm:$0xff]  ;;  %s1042_s5 = smov 1   ;;  %v268_v14 = vadd.f32 %v1191_v2, %v1187_v0  ;;  %s1043_s7 = smov 126  }
  0x51   : > { %1962 = vst [vmem:[#allocation23_spill] sm:$0xff] %v1191_v2  ;;  %1963 = vst [vmem:[#allocation24_spill] sm:$0xff] %v1195_v4  ;;  %v1199_v6 = vld [vmem:[%s152_s26 + $0x28] sm:$0xff]  ;;  %v271_v7 = vmax.f32 %v1189_v1, %v1195_v4  ;;  %v1203_v8 = vld [vmem:[%s152_s26 + $0x30] sm:$0xff]  ;;  %v272_v15 = vadd.f32 %v1195_v4, %v1189_v1  ;;  %s1243_s8 = sld [smem:[#allocation2 + $0x2]]  ;;  %v229_v21 = vand.u32 127, %v226_v20 }
  0x52   : > { %1964 = vst [vmem:[#allocation25_spill] sm:$0xff] %v1197_v5  ;;  %1965 = vst [vmem:[#allocation26_spill] sm:$0xff] %v1199_v6  ;;  %v1205_v9 = vld [vmem:[%s152_s26 + $0x38] sm:$0xff]  ;;  %v495_v10 = vmax.f32 %v1197_v5, %v1203_v8  ;;  %v496_v17 = vadd.f32 %v1203_v8, %v1197_v5  ;;  %s1245_s17 = sld [smem:[#allocation2 + $0x3]]  ;;  %v227_v22 = vshrl.u32 %v226_v20, 7 }
  0x53   : > { %1966 = vst [vmem:[#allocation27_spill] sm:$0xff] %v1203_v8  ;;  %1967 = vst [vmem:[#allocation28_spill] sm:$0xff] %v1205_v9  ;;  %v499_v11 = vmax.f32 %v1199_v6, %v1205_v9  ;;  %v1211_v12 = vmax.f32 %v267_v3, %v271_v7  ;;  %v1225_v16 = vadd.f32 %v272_v15, %v268_v14  ;;  %s1247_s19 = sld [smem:[#allocation2 + $0x7]]  ;;  %v1316_v24 = vadd.s32 1, %v229_v21 }
  0x54   : > { %v500_v18 = vadd.f32 %v1205_v9, %v1199_v6  ;;  %s1249_s25 = sld [smem:[#allocation2 + $0x8]]  ;;  %v1318_v25 = vadd.s32 4294967294, %v229_v21  ;;  %v1320_v26 = vadd.s32 4294967295, %v229_v21  ;;  %v1329_v30 = vadd.s32 2, %v229_v21 }
  0x55   : > { %281 = vrot.lane.b32.xlu1 %v1211_v12, %s1040_s20  ;;  %275 = vrot.lane.b32.xlu0 %v1211_v12, %s1041_s23  ;;  %v1215_v13 = vmax.f32 %v495_v10, %v499_v11  ;;  %s1251_s28 = sld [smem:[#allocation2 + $0xc]]  ;;  %v1338_v34 = vadd.s32 4294967294, %v227_v22  ;;  %v1343_v36 = vadd.s32 4294967295, %v227_v22  ;;  %v1345_v37 = vadd.s32 1, %v227_v22 }
  0x56   : > { %v1235_v19 = vadd.f32 %v500_v18, %v496_v17  ;;  %s1253_s24 = sld [smem:[#allocation2 + $0xd]]  ;;  %v1347_v38 = vadd.s32 2, %v227_v22  ;;  %vm252_vm0 = vcmp.lt.s32.totalorder %v1316_v24, 128  ;;  %vm235_vm1 = vcmp.ge.s32.totalorder %v1318_v25, 0 }
  0x57   : > { %s1255_s27 = sld [smem:[#allocation2 + $0x11]]  ;;  %v292_v23 = vstv %s1243_s8  ;;  %vm243_vm2 = vcmp.ge.s32.totalorder %v1320_v26, 0  ;;  %vm260_vm3 = vcmp.lt.s32.totalorder %v1329_v30, 128  ;;  %vm231_vm4 = vcmp.ge.s32.totalorder %v1338_v34, 0 }
  0x58   : > { %1968 = sst [smem:[#allocation29_spill]] %s1245_s17  ;;  %v1325_v27 = vmul.f32 %v292_v23, %v1211_v12  ;;  %v1921_v31 = vstv %s1245_s17  ;;  %v1336_v33 = vmul.f32 %v1215_v13, %v292_v23  ;;  %vm239_vm5 = vcmp.ge.s32.totalorder %v1343_v36, 0 }
  0x59   : > { %503 = vrot.lane.b32.xlu1 %v1215_v13, %s1041_s23  ;;  %278 = vrot.lane.b32.xlu0 %v1211_v12, %s1042_s5  ;;  %s1257_s29 = sld [smem:[#allocation2 + $0x12]]  ;;  %v309_v28 = vstv %s1247_s19  ;;  %vm248_vm6 = vcmp.lt.s32.totalorder %v1345_v37, 8  ;;  %vm256_vm7 = vcmp.lt.s32.totalorder %v1347_v38, 8 }
  0x5a   : > { %1969 = sst [smem:[#allocation30_spill]] %s1249_s25  ;;  %v1352_v39 = vmul.f32 %v309_v28, %v1211_v12  ;;  %v1913_v40 = vstv %s1249_s25  ;;  %v1359_v42 = vmul.f32 %v1215_v13, %v309_v28 }
  0x5b   : > { %s1259_s30 = sld [smem:[#allocation2 + $0x16]]  ;;  %v326_v29 = vstv %s1251_s28 }
  0x5c   : > { %1970 = sst [smem:[#allocation31_spill]] %s1253_s24  ;;  %v1356_v41 = vmul.f32 %v326_v29, %v1211_v12  ;;  %v1914_v43 = vstv %s1253_s24  ;;  %v1369_v46 = vmul.f32 %v1215_v13, %v326_v29 }
  0x5d   : > { %509 = vrot.lane.b32.xlu1 %v1215_v13, %s1040_s20  ;;  %506 = vrot.lane.b32.xlu0 %v1215_v13, %s1042_s5  ;;  %s1261_s3 = sld [smem:[#allocation2 + $0x17]]  ;;  %v341_v32 = vstv %s1255_s27 }
  0x5e   : > { %s1263_s4 = sld [smem:[#allocation2]]  ;;  %v1365_v44 = vmul.f32 %v341_v32, %v1211_v12  ;;  %v1378_v49 = vmul.f32 %v1215_v13, %v341_v32 }
  0x5f   : > { %1971 = sst [smem:[#allocation32_spill]] %s1257_s29  ;;  %v1917_v45 = vstv %s1257_s29 }
  0x60   : > { %s1265_s16 = sld [smem:[#allocation2 + $0x5]] }
  0x61   : > { %370 = vrot.lane.b32.xlu1 %v1225_v16, %s1041_s23  ;;  %284 = vrot.lane.b32.xlu0 %v1211_v12, %s1043_s7  ;;  %s1267_s26 = sld [smem:[#allocation2 + $0xa]]  ;;  %v358_v35 = vstv %s1259_s30 }
  0x62   : > { %s1277_s14 = sld [smem:[#allocation2 + $0xb]]  ;;  %v1374_v47 = vmul.f32 %v358_v35, %v1211_v12  ;;  %v1381_v50 = vmul.f32 %v1215_v13, %v358_v35 }
  0x63   : > { %1972 = sst [smem:[#allocation33_spill]] %s1261_s3  ;;  %v1918_v48 = vstv %s1261_s3 }
  0x64   : > { %1973 = sst [smem:[#allocation34_spill]] %s1263_s4  ;;  %v287_v51 = vstv %s1263_s4 }
  0x65   : > { %376 = vrot.lane.b32.xlu1 %v1225_v16, %s1040_s20  ;;  %373 = vrot.lane.b32.xlu0 %v1225_v16, %s1042_s5  ;;  %s1279_s0 = sld [smem:[#allocation2 + $0x10]] }
  0x66   : > { %s1281_s1 = sld [smem:[#allocation2 + $0x15]]  ;;  %v304_v52 = vstv %s1265_s16 }
  0x67   : > { %s1283_s18 = sld [smem:[#allocation2 + $0x19]]  ;;  %v321_v53 = vstv %s1267_s26 }
  0x68   : > { %s1285_s11 = sld [smem:[#allocation2 + $0x1e]]  ;;  %v1922_v58 = vstv %s1277_s14 }
  0x69   : > { %573 = vrot.lane.b32.xlu1 %v1235_v19, %s1041_s23  ;;  %512 = vrot.lane.b32.xlu0 %v1215_v13, %s1043_s7  ;;  %s1271_s23 = sld [smem:[#allocation2 + $0x14]] }
  0x6a   : > { %s1287_s10 = sld [smem:[#allocation2 + $0x23]] }
  0x6b   : > { %s1289_s15 = sld [smem:[#allocation2 + $0x28]]  ;;  %v1923_v59 = vstv %s1279_s0 }
  0x6c   : > { %1977 = sst [smem:[#allocation38_spill]] %s1281_s1  ;;  %v1931_v60 = vstv %s1281_s1 }
  0x6d   : > { %579 = vrot.lane.b32.xlu1 %v1235_v19, %s1040_s20  ;;  %576 = vrot.lane.b32.xlu0 %v1235_v19, %s1042_s5  ;;  %s1269_s20 = sld [smem:[#allocation2 + $0xf]] }
  0x6e   : > { %s1273_s5 = sld [smem:[#allocation2 + $0x1]] }
  0x6f   : > { %1975 = sst [smem:[#allocation36_spill]] %s1271_s23  ;;  %v353_v55 = vstv %s1271_s23 }
  0x70   : > { %1978 = sst [smem:[#allocation39_spill]] %s1283_s18 }
  0x71   : > { %582 = vrot.lane.b32.xlu1 %v1235_v19, %s1043_s7  ;;  %379 = vrot.lane.b32.xlu0 %v1225_v16, %s1043_s7  ;;  %s1275_s7 = sld [smem:[#allocation2 + $0x6]] }
  0x72   : > { %1979 = sst [smem:[#allocation40_spill]] %s1287_s10 }
  0x73   : > { %1974 = sst [smem:[#allocation35_spill]] %s1269_s20  ;;  %v336_v54 = vstv %s1269_s20 }
  0x74   : > { %1980 = sst [smem:[#allocation41_spill]] %s1289_s15  ;;  %v1925_v56 = vstv %s1273_s5  ;;  %v2016_v6 = vstv %s1273_s5 }
  0x75   : > { %s1291_s22 = sld [smem:[#allocation2 + $0x2d]] }
  0x76   : > { %s1293_s9 = sld [smem:[#allocation2 + $0x4]] }
  0x77   : > { %1976 = sst [smem:[#allocation37_spill]] %s1275_s7  ;;  %v1924_v57 = vstv %s1275_s7 }
  0x78   : > { %s1295_s12 = sld [smem:[#allocation2 + $0x9]] }
  0x79   : > { %s1297_s2 = sld [smem:[#allocation2 + $0xe]] }
  0x7a   : > { %s1299_s21 = sld [smem:[#allocation2 + $0x13]] }
  0x7b   : > { %1981 = sst [smem:[#allocation42_spill]] %s1291_s22 }
  0x7c   : > { %1982 = sst [smem:[#allocation43_spill]] %s1293_s9 }
  0x7d   : > { %s1301_s13 = sld [smem:[#allocation2 + $0x18]] }
  0x7e   : > { %s1303_s6 = sld [smem:[#allocation2 + $0x1b]] }
  0x7f   : > { %1983 = sst [smem:[#allocation44_spill]] %s1297_s2 }
  0x80   : > { %1984 = sst [smem:[#allocation45_spill]] %s1299_s21 }
  0x81   : > { %s1305_s10 = sld [smem:[#allocation2 + $0x1c]] }
  0x82   : > { %s1307_s22 = sld [smem:[#allocation2 + $0x20]] }
  0x83   : > { %s1309_s9 = sld [smem:[#allocation2 + $0x21]] }
  0x84   : > { %s1312_s2 = sld [smem:[#allocation2 + $0x25]]  ;;  %v387_v10 = vstv %s1303_s6 }
  0x85   : > { %s1314_s21 = sld [smem:[#allocation2 + $0x26]]  ;;  %v1425_v21 = vmul.f32 %v387_v10, %v1225_v16  ;;  %v1430_v28 = vmul.f32 %v1235_v19, %v387_v10 }
  0x86   : > { %s1331_s8 = sld [smem:[#allocation2 + $0x2b]] }
  0x87   : > { %1985 = sst [smem:[#allocation46_spill]] %s1305_s10 }
  0x88   : > { %s1322_s10 = sld [smem:[#allocation2 + $0x2a]]  ;;  %v404_v13 = vstv %s1307_s22 }
  0x89   : > { %1986 = sst [smem:[#allocation47_spill]] %s1309_s9  ;;  %v1435_v29 = vmul.f32 %v404_v13, %v1225_v16  ;;  %v1442_v7 = vmul.f32 %v1235_v19, %v404_v13 }
  0x8a   : > { %s1349_s19 = sld [smem:[#allocation2 + $0x30]]  ;;  %v421_v14 = vstv %s1312_s2 }
  0x8b   : > { %1987 = sst [smem:[#allocation48_spill]] %s1314_s21  ;;  %v1439_v35 = vmul.f32 %v421_v14, %v1225_v16  ;;  %v1450_v17 = vmul.f32 %v1235_v19, %v421_v14 }
  0x8c   : > { %1988 = sst [smem:[#allocation49_spill]] %s1331_s8 }
  0x8d   : > { %s1340_s21 = sld [smem:[#allocation2 + $0x2f]] }
  0x8e   : > { %s1361_s28 = sld [smem:[#allocation2 + $0x1a]]  ;;  %v436_v20 = vstv %s1322_s10 }
  0x8f   : > { %s1371_s27 = sld [smem:[#allocation2 + $0x1f]]  ;;  %v1446_v10 = vmul.f32 %v436_v20, %v1225_v16  ;;  %v1457_v13 = vmul.f32 %v1235_v19, %v436_v20 }
  0x90   : > { %s1383_s30 = sld [smem:[#allocation2 + $0x24]] }
  0x91   : > { %s1990_s29 = sld [smem:[#allocation40_spill]] }
  0x92   : > { %s1991_s3 = sld [smem:[#allocation42_spill]] }
  0x93   : > { %s1391_s24 = sld [smem:[#allocation2 + $0x29]]  ;;  %v453_v23 = vstv %s1340_s21 }
  0x94   : > { %s1993_s25 = sld [smem:[#allocation43_spill]]  ;;  %v1453_v32 = vmul.f32 %v453_v23, %v1225_v16  ;;  %v1460_v22 = vmul.f32 %v1235_v19, %v453_v23 }
  0x95   : > { %s1397_s17 = sld [smem:[#allocation2 + $0x2e]] }
  0x96   : > { %1989 = sst [smem:[#allocation50_spill]] %s1383_s30 }
  0x97   : > { %s1994_s30 = sld [smem:[#allocation44_spill]] }
  0x98   : > { %s1995_s4 = sld [smem:[#allocation45_spill]] }
  0x99   : > { %1992 = sst [smem:[#allocation40_spill]] %s1391_s24 }
  0x9a   : > { %s1403_s20 = sld [smem:[#allocation2 + $0x1d]] }
  0x9b   : > { %s1997_s23 = sld [smem:[#allocation46_spill]]  ;;  %v2069_v26 = vstv %s1397_s17 }
  0x9c   : > { %s1409_s7 = sld [smem:[#allocation2 + $0x22]] }
  0x9d   : > { %s1415_s1 = sld [smem:[#allocation2 + $0x27]] }
  0x9e   : > { %s1421_s15 = sld [smem:[#allocation2 + $0x2c]] }
  0x9f   : > { %s1432_s2 = sld [smem:[#allocation2 + $0x31]] }
  0xa0   : > { %1996 = sst [smem:[#allocation42_spill]] %s1403_s20 }
  0xa1   : > { %s2001_s21 = sld [smem:[#allocation29_spill]] }
  0xa2   : > { %s2002_s22 = sld [smem:[#allocation30_spill]] }
  0xa3   : > { %s2003_s6 = sld [smem:[#allocation31_spill]] }
  0xa4   : > { %1999 = sst [smem:[#allocation43_spill]] %s1421_s15 }
  0xa5   : > { %s2004_s9 = sld [smem:[#allocation32_spill]] }
  0xa6   : > { %s2005_s18 = sld [smem:[#allocation33_spill]] }
  0xa7   : > { %s2009_s20 = sld [smem:[#allocation37_spill]]  ;;  %v2011_v4 = vstv %s2001_s21 }
  0xa8   : > { %s2010_s15 = sld [smem:[#allocation38_spill]]  ;;  %v2012_v1 = vstv %s2002_s22 }
  0xa9   : > { %s2019_s24 = sld [smem:[#allocation39_spill]] }
  0xaa   : > { %s2041_s16 = sld [smem:[#allocation40_spill]] }
  0xac   : > { %v2015_v8 = vstv %s2005_s18  ;;  %s2033_s18 = sld [smem:[#allocation49_spill]] }
  0xaf   : > { %v2048_v25 = vstv %s2019_s24 }
  0xc7   : > { %v282_v18 = vpop.permute.xlu1 %281  ;;  %v276_v12 = vpop.permute.xlu0 %275 }
  0xc8   : > { %v283_v20 = vsel %vm252_vm0, %v282_v18, 0.0  ;;  %v277_v3 = vsel %vm235_vm1, %v276_v12, 0.0 }
  0xc9   : > { %v295_v63 = vmul.f32 %v1921_v31, %v283_v20  ;;  %v312_v62 = vmul.f32 %v1913_v40, %v283_v20  ;;  %v329_v14 = vmul.f32 %v1914_v43, %v283_v20  ;;  %v344_v11 = vmul.f32 %v1917_v45, %v283_v20 }
  0xca   : > { %v361_v16 = vmul.f32 %v1918_v48, %v283_v20  ;;  %v288_v12 = vmul.f32 %v287_v51, %v277_v3  ;;  %v305_v23 = vmul.f32 %v304_v52, %v277_v3  ;;  %v322_v19 = vmul.f32 %v321_v53, %v277_v3 }
  0xcb   : > { %v504_v40 = vpop.permute.xlu1 %503  ;;  %v279_v43 = vpop.permute.xlu0 %278  ;;  %v296_v20 = vadd.f32 %v295_v63, %v1325_v27  ;;  %v313_v61 = vadd.f32 %v312_v62, %v1352_v39  ;;  %v1495_v18 = vadd.f32 %v329_v14, %v1356_v41  ;;  %v1500_v48 = vadd.f32 %v344_v11, %v1365_v44 }
  0xcc   : > { %v505_v15 = vsel %vm235_vm1, %v504_v40, 0.0  ;;  %v1503_v31 = vadd.f32 %v361_v16, %v1374_v47  ;;  %v337_v45 = vmul.f32 %v336_v54, %v277_v3  ;;  %v354_v27 = vmul.f32 %v353_v55, %v277_v3 }
  0xcd   : > { %v515_v39 = vmul.f32 %v505_v15, %v287_v51  ;;  %v527_v41 = vmul.f32 %v505_v15, %v304_v52  ;;  %v539_v40 = vmul.f32 %v505_v15, %v321_v53  ;;  %v280_v44 = vsel %vm243_vm2, %v279_v43, 0.0 }
  0xce   : > { %v290_v47 = vmul.f32 %v1925_v56, %v280_v44  ;;  %v307_v62 = vmul.f32 %v1924_v57, %v280_v44  ;;  %v324_v63 = vmul.f32 %v1922_v58, %v280_v44  ;;  %v339_v3 = vmul.f32 %v1923_v59, %v280_v44 }
  0xcf   : > { %v510_v51 = vpop.permute.xlu1 %509  ;;  %v507_v52 = vpop.permute.xlu0 %506  ;;  %v549_v53 = vmul.f32 %v505_v15, %v336_v54  ;;  %v356_v43 = vmul.f32 %v1931_v60, %v280_v44  ;;  %v561_v16 = vmul.f32 %v505_v15, %v353_v55  ;;  %v2013_v54 = vstv %s2003_s6 }
  0xd0   : > { %v511_v11 = vsel %vm252_vm0, %v510_v51, 0.0  ;;  %v508_v14 = vsel %vm243_vm2, %v507_v52, 0.0  ;;  %v291_v58 = vadd.f32 %v290_v47, %v288_v12  ;;  %v308_v59 = vadd.f32 %v307_v62, %v305_v23 }
  0xd1   : > { %v325_v57 = vadd.f32 %v324_v63, %v322_v19  ;;  %v340_v56 = vadd.f32 %v339_v3, %v337_v45  ;;  %v519_v2 = vmul.f32 %v511_v11, %v2011_v4  ;;  %v531_v0 = vmul.f32 %v511_v11, %v2012_v1 }
  0xd2   : > { %v543_v9 = vmul.f32 %v511_v11, %v2013_v54  ;;  %v2014_v44 = vstv %s2004_s9  ;;  %v565_v51 = vmul.f32 %v511_v11, %v2015_v8  ;;  %v516_v5 = vmul.f32 %v508_v14, %v2016_v6  ;;  %s2020_s9 = sld [smem:[#allocation41_spill]] }
  0xd3   : > { %v553_v60 = vmul.f32 %v511_v11, %v2014_v44  ;;  %v2017_v52 = vstv %s2009_s20  ;;  %v371_v15 = vpop.permute.xlu1 %370  ;;  %v357_v23 = vadd.f32 %v356_v43, %v354_v27  ;;  %v1551_v45 = vadd.f32 %v519_v2, %v1336_v33  ;;  %v285_v33 = vpop.permute.xlu0 %284 }
  0xd4   : > { %v528_v55 = vmul.f32 %v508_v14, %v2017_v52  ;;  %v1554_v4 = vadd.f32 %v531_v0, %v1359_v42  ;;  %v2018_v1 = vstv %s1277_s14  ;;  %v1561_v6 = vadd.f32 %v543_v9, %v1369_v46  ;;  %s2040_s14 = sld [smem:[#allocation50_spill]] }
  0xd5   : > { %v540_v19 = vmul.f32 %v508_v14, %v2018_v1  ;;  %v1564_v8 = vadd.f32 %v553_v60, %v1378_v49  ;;  %v1567_v2 = vadd.f32 %v565_v51, %v1381_v50  ;;  %v1569_v0 = vadd.f32 %v516_v5, %v515_v39 }
  0xd6   : > { %v1572_v42 = vadd.f32 %v528_v55, %v527_v41  ;;  %v2021_v12 = vstv %s1279_s0  ;;  %v2022_v9 = vstv %s2010_s15  ;;  %v372_v49 = vsel %vm235_vm1, %v371_v15, 0.0  ;;  %s2031_s0 = sld [smem:[#allocation47_spill]] }
  0xd7   : > { %v550_v27 = vmul.f32 %v508_v14, %v2021_v12  ;;  %v562_v46 = vmul.f32 %v508_v14, %v2022_v9  ;;  %v1581_v50 = vadd.f32 %v540_v19, %v539_v40  ;;  %v2023_v5 = vstv %s2019_s24  ;;  %v377_v15 = vpop.permute.xlu1 %376  ;;  %s2032_s15 = sld [smem:[#allocation48_spill]] }
  0xd8   : > { %v383_v60 = vmul.f32 %v2023_v5, %v372_v49  ;;  %v2024_v39 = vstv %s1285_s11  ;;  %v2025_v41 = vstv %s1990_s29  ;;  %v2026_v43 = vstv %s2020_s9 }
  0xd9   : > { %v400_v47 = vmul.f32 %v2024_v39, %v372_v49  ;;  %v417_v62 = vmul.f32 %v2025_v41, %v372_v49  ;;  %v1589_v63 = vadd.f32 %v550_v27, %v549_v53  ;;  %v1591_v3 = vadd.f32 %v562_v46, %v561_v16  ;;  %v374_v39 = vpop.permute.xlu0 %373 }
  0xda   : > { %v432_v11 = vmul.f32 %v2026_v43, %v372_v49  ;;  %v286_v14 = vsel %vm260_vm3, %v285_v33, 0.0  ;;  %v297_v40 = vadd.f32 %v296_v20, %v291_v58  ;;  %v2027_v54 = vstv %s1993_s25 }
  0xdb   : > { %v299_v44 = vmul.f32 %v2027_v54, %v286_v14  ;;  %v314_v51 = vadd.f32 %v313_v61, %v308_v59  ;;  %v2028_v52 = vstv %s1295_s12  ;;  %v331_v1 = vadd.f32 %v1495_v18, %v325_v57 }
  0xdc   : > { %v316_v55 = vmul.f32 %v2028_v52, %v286_v14  ;;  %v2029_v53 = vstv %s1994_s30  ;;  %v346_v16 = vadd.f32 %v1500_v48, %v340_v56  ;;  %v2030_v12 = vstv %s1995_s4 }
  0xdd   : > { %v333_v19 = vmul.f32 %v2029_v53, %v286_v14  ;;  %v348_v27 = vmul.f32 %v2030_v12, %v286_v14  ;;  %v300_v9 = vadd.f32 %v299_v44, %v297_v40  ;;  %v363_v20 = vadd.f32 %v1503_v31, %v357_v23 }
  0xde   : > { %v317_v58 = vadd.f32 %v316_v55, %v314_v51  ;;  %v2034_v59 = vstv %s1301_s13  ;;  %v2035_v33 = vstv %s1991_s3  ;;  %v378_v18 = vsel %vm252_vm0, %v377_v15, 0.0 }
  0xdf   : > { %v365_v61 = vmul.f32 %v2034_v59, %v286_v14  ;;  %v449_v46 = vmul.f32 %v2035_v33, %v372_v49  ;;  %v334_v5 = vadd.f32 %v333_v19, %v331_v1  ;;  %v349_v57 = vadd.f32 %v348_v27, %v346_v16  ;;  %v574_v27 = vpop.permute.xlu1 %573 }
  0xe0   : > { %v301_v48 = vrot.slane %v300_v9, 6  ;;  %v318_v56 = vrot.slane %v317_v58, 7  ;;  %v2036_v43 = vstv %s1997_s23  ;;  %v2037_v44 = vstv %s2031_s0 }
  0xe1   : > { %v366_v41 = vadd.f32 %v365_v61, %v363_v20  ;;  %v390_v54 = vmul.f32 %v2036_v43, %v378_v18  ;;  %v350_v40 = vrot.slane %v349_v57, 1  ;;  %v407_v51 = vmul.f32 %v2037_v44, %v378_v18 }
  0xe2   : > { %v2038_v31 = vstv %s2032_s15  ;;  %v2039_v14 = vstv %s2033_s18  ;;  %v302_v52 = vsel %vm231_vm4, %v301_v48, 0.0  ;;  %v319_v55 = vsel %vm239_vm5, %v318_v56, 0.0 }
  0xe3   : > { %v424_v23 = vmul.f32 %v2038_v31, %v378_v18  ;;  %v439_v49 = vmul.f32 %v2039_v14, %v378_v18  ;;  %v367_v15 = vrot.slane %v366_v41, 2  ;;  %v375_v1 = vsel %vm243_vm2, %v374_v39, 0.0 }
  0xe4   : > { %v335_v53 = vadd.f32 %v334_v5, %v302_v52  ;;  %v351_v19 = vsel %vm248_vm6, %v350_v40, 0.0  ;;  %v1631_v16 = vadd.f32 %v390_v54, %v1425_v21  ;;  %v1634_v12 = vadd.f32 %v407_v51, %v1435_v29  ;;  %v513_v54 = vpop.permute.xlu0 %512 }
  0xe5   : > { %v1636_v9 = vadd.f32 %v351_v19, %v319_v55  ;;  %v368_v58 = vsel %vm256_vm7, %v367_v15, 0.0  ;;  %v1641_v20 = vadd.f32 %v424_v23, %v1439_v35  ;;  %v2042_v59 = vstv %s1349_s19 }
  0xe6   : > { %v456_v61 = vmul.f32 %v2042_v59, %v378_v18  ;;  %v1646_v33 = vadd.f32 %v439_v49, %v1446_v10  ;;  %v2043_v21 = vstv %s1361_s28  ;;  %v2044_v29 = vstv %s1371_s27 }
  0xe7   : > { %v385_v5 = vmul.f32 %v2043_v21, %v375_v1  ;;  %v402_v57 = vmul.f32 %v2044_v29, %v375_v1  ;;  %v2045_v39 = vstv %s2040_s14  ;;  %v1654_v56 = vadd.f32 %v368_v58, %v335_v53 }
  0xe8   : > { %v419_v48 = vmul.f32 %v2045_v39, %v375_v1  ;;  %v2046_v35 = vstv %s2041_s16  ;;  %v2047_v43 = vstv %s1397_s17  ;;  %v575_v10 = vsel %vm235_vm1, %v574_v27, 0.0 }
  0xe9   : > { %v434_v41 = vmul.f32 %v2046_v35, %v375_v1  ;;  %v451_v18 = vmul.f32 %v2047_v43, %v375_v1  ;;  %v1663_v40 = vadd.f32 %v456_v61, %v1453_v32  ;;  %v1665_v44 = vadd.f32 %v385_v5, %v383_v60 }
  0xea   : > { %v1667_v51 = vadd.f32 %v402_v57, %v400_v47  ;;  %v1669_v31 = vadd.f32 %v419_v48, %v417_v62  ;;  %v585_v49 = vmul.f32 %v575_v10, %v2048_v25  ;;  %v2049_v52 = vstv %s1285_s11  ;;  %v580_v62 = vpop.permute.xlu1 %579  ;;  %s2062_s11 = sld [smem:[#allocation42_spill]] }
  0xeb   : > { %v1671_v23 = vadd.f32 %v434_v41, %v432_v11  ;;  %v1673_v14 = vadd.f32 %v451_v18, %v449_v46  ;;  %v597_v55 = vmul.f32 %v575_v10, %v2049_v52  ;;  %v2050_v15 = vstv %s1990_s29 }
  0xec   : > { %v609_v32 = vmul.f32 %v575_v10, %v2050_v15  ;;  %v2051_v1 = vstv %s2020_s9  ;;  %v2052_v53 = vstv %s1991_s3  ;;  %v514_v47 = vsel %vm260_vm3, %v513_v54, 0.0  ;;  %v577_v15 = vpop.permute.xlu0 %576  ;;  %s2087_s3 = sld [smem:[#allocation18_spill]] }
  0xed   : > { %v619_v60 = vmul.f32 %v575_v10, %v2051_v1  ;;  %v631_v19 = vmul.f32 %v575_v10, %v2052_v53  ;;  %v521_v11 = vadd.f32 %v1551_v45, %v1569_v0  ;;  %v2053_v46 = vstv %s1993_s25 }
  0xee   : > { %v522_v27 = vmul.f32 %v514_v47, %v2053_v46  ;;  %v533_v58 = vadd.f32 %v1554_v4, %v1572_v42  ;;  %v2054_v59 = vstv %s1295_s12  ;;  %v2055_v21 = vstv %s1994_s30  ;;  %s2064_s12 = sld [smem:[#allocation43_spill]] }
  0xef   : > { %v534_v61 = vmul.f32 %v514_v47, %v2054_v59  ;;  %v546_v5 = vmul.f32 %v514_v47, %v2055_v21  ;;  %v555_v29 = vadd.f32 %v1564_v8, %v1589_v63  ;;  %v2056_v57 = vstv %s1995_s4 }
  0xf0   : > { %v556_v39 = vmul.f32 %v514_v47, %v2056_v57  ;;  %v567_v48 = vadd.f32 %v1567_v2, %v1591_v3  ;;  %v523_v35 = vadd.f32 %v522_v27, %v521_v11  ;;  %v2057_v0 = vstv %s1301_s13  ;;  %s2081_s13 = sld [smem:[#allocation15_spill]] }
  0xf1   : > { %v535_v45 = vadd.f32 %v534_v61, %v533_v58  ;;  %v568_v41 = vmul.f32 %v514_v47, %v2057_v0  ;;  %v581_v4 = vsel %vm252_vm0, %v580_v62, 0.0  ;;  %v545_v42 = vadd.f32 %v1561_v6, %v1581_v50  ;;  %v583_v6 = vpop.permute.xlu1 %582 }
  0xf2   : > { %v557_v43 = vadd.f32 %v556_v39, %v555_v29  ;;  %v2058_v18 = vstv %s1997_s23  ;;  %v2059_v8 = vstv %s2031_s0  ;;  %v524_v54 = vrot.slane %v523_v35, 6  ;;  %s2088_s23 = sld [smem:[#allocation53_spill]]  ;;  %p2093_p13 = scmp.ne.s32.totalorder %s2087_s3, 0 }
  0xf3   : > { %v589_v10 = vmul.f32 %v581_v4, %v2058_v18  ;;  %v601_v63 = vmul.f32 %v581_v4, %v2059_v8  ;;  %v536_v25 = vrot.slane %v535_v45, 7  ;;  %v569_v2 = vadd.f32 %v568_v41, %v567_v48  ;;  %v380_v8 = vpop.permute.xlu0 %379 }
  0xf4   : > { %v2060_v3 = vstv %s2032_s15  ;;  %v547_v1 = vadd.f32 %v546_v5, %v545_v42  ;;  %v558_v53 = vrot.slane %v557_v43, 1  ;;  %v2061_v47 = vstv %s2033_s18 }
  0xf5   : > { %v613_v52 = vmul.f32 %v581_v4, %v2060_v3  ;;  %v590_v24 = vadd.f32 %v589_v10, %v1430_v28  ;;  %v623_v62 = vmul.f32 %v581_v4, %v2061_v47  ;;  %v525_v50 = vsel %vm231_vm4, %v524_v54, 0.0 }
  0xf6   : > { %v537_v11 = vsel %vm239_vm5, %v536_v25, 0.0  ;;  %v570_v46 = vrot.slane %v569_v2, 2  ;;  %v602_v27 = vadd.f32 %v601_v63, %v1442_v7  ;;  %v548_v58 = vadd.f32 %v547_v1, %v525_v50  ;;  %s853_s29 = sshll.u32 %s2081_s13, 10 }
  0xf7   : > { %v559_v28 = vsel %vm248_vm6, %v558_v53, 0.0  ;;  %v614_v59 = vadd.f32 %v613_v52, %v1450_v17  ;;  %v2063_v61 = vstv %s1349_s19  ;;  %v624_v29 = vadd.f32 %v623_v62, %v1457_v13  ;;  %s1044_s19 = smov [#allocation7]  }
  0xf8   : > { %v635_v21 = vmul.f32 %v581_v4, %v2063_v61  ;;  %v560_v5 = vadd.f32 %v559_v28, %v537_v11  ;;  %v578_v57 = vsel %vm243_vm2, %v577_v15, 0.0  ;;  %v584_v7 = vsel %vm260_vm3, %v583_v6, 0.0  ;;  %s1806_s5 = scalar_lea.hbm %s2088_s23, %s853_s29 }
  0xf9   : > { %v571_v39 = vsel %vm256_vm7, %v570_v46, 0.0  ;;  %v2065_v17 = vstv %s1361_s28  ;;  %v2066_v45 = vstv %s1371_s27  ;;  %v2067_v41 = vstv %s2040_s14  ;;  %s970_s28 = sshll.u32 %s1044_s19, 4  ;;  %s971_s28 = int_to_ptr.vmem [resolvable:$false] %s970_s28 }
  0xfa   : > { %v636_v48 = vadd.f32 %v635_v21, %v1460_v22  ;;  %v586_v35 = vmul.f32 %v578_v57, %v2065_v17  ;;  %v598_v0 = vmul.f32 %v578_v57, %v2066_v45  ;;  %v610_v4 = vmul.f32 %v578_v57, %v2067_v41  ;;  %s972_s27 = scalar_lea.vmem %s971_s28, 2048 }
  0xfb   : > { %v2068_v13 = vstv %s2041_s16  ;;  %v632_v43 = vmul.f32 %v578_v57, %v2069_v26  ;;  %v2070_v18 = vstv %s2062_s11  ;;  %v2071_v25 = vstv %s1409_s7 }
  0xfc   : > { %v620_v42 = vmul.f32 %v578_v57, %v2068_v13  ;;  %v592_v10 = vmul.f32 %v584_v7, %v2070_v18  ;;  %v587_v63 = vadd.f32 %v586_v35, %v585_v49  ;;  %v599_v54 = vadd.f32 %v598_v0, %v597_v55 }
  0xfd   : > { %v604_v2 = vmul.f32 %v584_v7, %v2071_v25  ;;  %v2072_v3 = vstv %s1415_s1  ;;  %v611_v52 = vadd.f32 %v610_v4, %v609_v32  ;;  %v633_v1 = vadd.f32 %v632_v43, %v631_v19  ;;  %s2080_s1 = sld [smem:[#allocation20_spill]] }
  0xfe   : > { %v616_v22 = vmul.f32 %v584_v7, %v2072_v3  ;;  %v621_v15 = vadd.f32 %v620_v42, %v619_v60  ;;  %v2073_v53 = vstv %s2064_s12  ;;  %v591_v62 = vadd.f32 %v590_v24, %v587_v63 }
  0xff   : > { %v626_v47 = vmul.f32 %v584_v7, %v2073_v53  ;;  %v603_v6 = vadd.f32 %v602_v27, %v599_v54  ;;  %v2074_v50 = vstv %s1432_s2  ;;  %v381_v46 = vsel %vm260_vm3, %v380_v8, 0.0 }
 0x100   : > { %v638_v11 = vmul.f32 %v584_v7, %v2074_v50  ;;  %v572_v49 = vadd.f32 %v571_v39, %v548_v58  ;;  %v615_v55 = vadd.f32 %v614_v59, %v611_v52  ;;  %v625_v28 = vadd.f32 %v624_v29, %v621_v15 }
 0x101   : > { %v637_v61 = vadd.f32 %v636_v48, %v633_v1  ;;  %v593_v21 = vadd.f32 %v592_v10, %v591_v62  ;;  %v605_v57 = vadd.f32 %v604_v2, %v603_v6  ;;  %v392_v32 = vadd.f32 %v1631_v16, %v1665_v44 }
 0x102   : > { %v2075_v60 = vmov %v2070_v18  ;;  %v627_v17 = vadd.f32 %v626_v47, %v625_v28  ;;  %v409_v27 = vadd.f32 %v1634_v12, %v1667_v51  ;;  %v2076_v7 = vmov %v2071_v25 }
 0x103   : > { %v394_v19 = vmul.f32 %v2075_v60, %v381_v46  ;;  %v639_v24 = vadd.f32 %v638_v11, %v637_v61  ;;  %v411_v30 = vmul.f32 %v2076_v7, %v381_v46  ;;  %v594_v35 = vrot.slane %v593_v21, 6  ;;  %v2084_v7 = vld [vmem:[#allocation27_spill] sm:$0xff]  ;;  %s2086_s17 = sshll.u32 %s2080_s1, 6  ;;  %s669_s7 = scalar_lea.sflag [#allocation4], %s2080_s1 }
 0x104   : > { %v606_v58 = vrot.slane %v605_v57, 7  ;;  %v617_v59 = vadd.f32 %v616_v22, %v615_v55  ;;  %v628_v39 = vrot.slane %v627_v17, 1  ;;  %v2077_v0 = vmov %v2072_v3  ;;  %s173_s25 = scalar_lea.vmem [#allocation7], %s2086_s17 }
 0x105   : > { %v395_v29 = vadd.f32 %v394_v19, %v392_v32  ;;  %v640_v48 = vrot.slane %v639_v24, 2  ;;  %v412_v45 = vadd.f32 %v411_v30, %v409_v27  ;;  %v428_v41 = vmul.f32 %v2077_v0, %v381_v46  ;;  %v2082_v19 = vld [vmem:[#allocation25_spill] sm:$0xff]  ;;  %v2083_v24 = vld [vmem:[#allocation26_spill] sm:$0xff]  ;;  %s682_s4 = sshll.u32 %s173_s25, 4  ;;  %s1808_s4 = int_to_ptr.vmem [resolvable:$true] %s682_s4 }
 0x106   : > { %v595_v16 = vsel %vm231_vm4, %v594_v35, 0.0  ;;  %v607_v44 = vsel %vm239_vm5, %v606_v58, 0.0  ;;  %v426_v12 = vadd.f32 %v1641_v20, %v1669_v31  ;;  %v629_v42 = vsel %vm248_vm6, %v628_v39, 0.0  ;;  %v2085_v35 = vld [vmem:[#allocation28_spill] sm:$0xff]  ;;  %v2090_v0 = vld [vmem:[#allocation22_spill] sm:$0xff]  ;;  %s966_s8 = scalar_lea.vmem %s1808_s4, 1024  ;;  %p973_p9 = scmp.lt.s32.totalorder %s1808_s4, %s971_s28 }
 0x107   : > { %v396_v4 = vrot.slane %v395_v29, 6  ;;  %v596_v51 = vadd.f32 %v595_v16, %v572_v49  ;;  %v608_v13 = vadd.f32 %v607_v44, %v560_v5  ;;  %v441_v26 = vadd.f32 %v1646_v33, %v1671_v23  ;;  %v2091_v16 = vld [vmem:[#allocation23_spill] sm:$0xff]  ;;  %p967_p12 = scmp.ne.s32.totalorder %s1808_s4, %s966_s8  ;;  %p974_p10 = scmp.lt.s32.totalorder %s972_s27, %s966_s8 }
 0x108   : > { %v641_v43 = vsel %vm256_vm7, %v640_v48, 0.0  ;;  %v413_v10 = vrot.slane %v412_v45, 7  ;;  %v2078_v8 = vmov %v2073_v53  ;;  %v429_v5 = vadd.f32 %v428_v41, %v426_v12  ;;  %v2089_v48 = vld [vmem:[#allocation21_spill] sm:$0xff] }
 0x109   : > { %v397_v18 = vsel %vm231_vm4, %v396_v4, 0.0  ;;  %v443_v63 = vmul.f32 %v2078_v8, %v381_v46  ;;  %v618_v54 = vadd.f32 %v617_v59, %v596_v51  ;;  %v630_v20 = vadd.f32 %v629_v42, %v608_v13  ;;  %v2092_v4 = vld [vmem:[#allocation24_spill] sm:$0xff]  ;;  %p968_p0 = pnand %p967_p12, %p2093_p13  ;;  %p975_p1 = por %p974_p10, %p973_p9 }
 0x10a   : > { %v398_v31 = vadd.f32 %v397_v18, %v1654_v56  ;;  %v414_v25 = vsel %vm239_vm5, %v413_v10, 0.0  ;;  %v458_v33 = vadd.f32 %v1663_v40, %v1673_v14  ;;  %v2079_v23 = vmov %v2074_v50 }
 0x10b   : > { %v444_v2 = vadd.f32 %v443_v63, %v441_v26  ;;  %v460_v3 = vmul.f32 %v2079_v23, %v381_v46  ;;  %v642_v22 = vadd.f32 %v641_v43, %v618_v54  ;;  %v415_v34 = vadd.f32 %v414_v25, %v1636_v9  ;;  %p969_p8 = pneg %p968_p0 }
 0x10c   : > { %v430_v52 = vadd.f32 %v429_v5, %v398_v31 }
 0x10d   : > { %v445_v15 = vrot.slane %v444_v2, 1  ;;  %v461_v1 = vadd.f32 %v460_v3, %v458_v33  ;;  %v643_v53 = vadd.f32 %v642_v22, %v630_v20  ;;  %p976_p2 = pnand %p975_p1, %p969_p8 }
 0x10f   : > { %v446_v56 = vsel %vm248_vm6, %v445_v15, 0.0  ;;  %v462_v47 = vrot.slane %v461_v1, 2  ;;  %v644_v62 = vmax.f32 %v643_v53, -60.0 }
 0x110   : > { %v447_v36 = vadd.f32 %v446_v56, %v415_v34 }
 0x111   : > { %v463_v6 = vsel %vm256_vm7, %v462_v47, 0.0  ;;  %v645_v50 = vsub.f32 0.0, %v644_v62 }
 0x112   : > { %v464_v40 = vadd.f32 %v463_v6, %v430_v52 }
 0x113   : > { %v646_v14 = vmul.f32 1.442695, %v645_v50 }
 0x114   : > { %v465_v11 = vadd.f32 %v464_v40, %v447_v36 }
 0x115   : > { %919 = vpow2.f32 %v646_v14 }
 0x116   : > { %v466_v46 = vmax.f32 %v465_v11, -60.0 }
 0x118   : > { %v467_v9 = vsub.f32 0.0, %v466_v46 }
 0x11a   : > { %v468_v49 = vmul.f32 1.442695, %v467_v9 }
 0x11c   : > { %921 = vpow2.f32 %v468_v49 }
 0x122   : > { %v920_v55 = vpop.eup %919 }
 0x123   : > { %v648_v28 = vadd.f32 1.0, %v920_v55 }
 0x125   : > { %923 = vrcp.f32 %v648_v28 }
 0x129   : > { %v922_v37 = vpop.eup %921 }
 0x12a   : > { %v470_v61 = vadd.f32 1.0, %v922_v37 }
 0x12c   : > { %925 = vrcp.f32 %v470_v61 }
 0x132   : > { %v924_v21 = vpop.eup %923 }
 0x133   : > { %v650_v38 = vmul.f32 %v924_v21, %v648_v28 }
 0x135   : > { %v651_v57 = vsub.f32 2.0, %v650_v38 }
 0x137   : > { %v652_v32 = vmul.f32 %v924_v21, %v651_v57 }
 0x139   : > { %v926_v60 = vpop.eup %925  ;;  %v653_v17 = vmul.f32 %v2082_v19, %v652_v32  ;;  %v657_v27 = vmul.f32 %v2083_v24, %v652_v32  ;;  %v661_v30 = vmul.f32 %v2084_v7, %v652_v32  ;;  %v665_v58 = vmul.f32 %v2085_v35, %v652_v32 }
 0x13a   : > { %v472_v59 = vmul.f32 %v926_v60, %v470_v61 }
 0x13b   : > { %840 = vst [vmem:[%s173_s25 + $0x20] sm:$0xff] %v653_v17  ;;  %842 = vst [vmem:[%s173_s25 + $0x28] sm:$0xff] %v657_v27 }
 0x13c   : > { %844 = vst [vmem:[%s173_s25 + $0x30] sm:$0xff] %v661_v30  ;;  %846 = vst [vmem:[%s173_s25 + $0x38] sm:$0xff] %v665_v58  ;;  %v473_v29 = vsub.f32 2.0, %v472_v59 }
 0x13e   : > { %v474_v39 = vmul.f32 %v926_v60, %v473_v29 }
 0x140   : > { %v475_v45 = vmul.f32 %v474_v39, %v2089_v48  ;;  %v478_v41 = vmul.f32 %v2090_v0, %v474_v39  ;;  %v482_v44 = vmul.f32 %v2091_v16, %v474_v39  ;;  %v486_v12 = vmul.f32 %v2092_v4, %v474_v39 }
 0x142   : > { %476 = vst [vmem:[%s173_s25] sm:$0xff] %v475_v45  ;;  %831 = vst [vmem:[%s173_s25 + $0x8] sm:$0xff] %v478_v41 }
 0x143   : > { %833 = vst [vmem:[%s173_s25 + $0x10] sm:$0xff] %v482_v44  ;;  %835 = vst [vmem:[%s173_s25 + $0x18] sm:$0xff] %v486_v12 }
 0x144   : > { %979 = shalt.err (!%p976_p2)
}
 0x145   : > { %s980_s30 = scalar_lea.hbm %s1806_s5, 1024  ;;  %s984_s21 = scalar_lea.hbm %s2088_s23, 8192 }
 0x146   : > { %p981_p3 = scmp.ne.s32.totalorder %s1806_s5, %s980_s30  ;;  %p985_p4 = scmp.lt.s32.totalorder %s1806_s5, %s2088_s23 }
 0x147   : > { %p986_p6 = scmp.lt.s32.totalorder %s984_s21, %s980_s30 }
 0x148   : > { %p982_p7 = pnand %p981_p3, %p2093_p13 }
 0x149   : > { %p987_p11 = por %p986_p6, %p985_p4 }
 0x14a   : > { %p983_p5 = pneg %p982_p7 }
 0x14c   : > { %p988_p12 = pnand %p987_p11, %p983_p5 }
 0x14e   : > { %991 = shalt.err (!%p988_p12)
}
 0x14f   : > { %s1045_s24 = smov 128   ;;  %s1046_s9 = smov 8  }
 0x150   : > { %860 = dma.vmem_to_hbm [thread:$0]  (%p2093_p13), %s1808_s4, 1024, %s1806_s5, %s669_s7, %s1045_s24, %s1045_s24, %s1046_s9  }
 0x151 PF: > { %s2094_s0 = sld [smem:[#allocation14_spill]] }
 0x152   : > { %s2095_s15 = sld [smem:[#allocation11_spill]] }
 0x153   : > { %s2096_s18 = sld [smem:[#allocation19_spill]] }
 0x157   : > { %p877_p0 = scmp.ge.s32.totalorder %s2094_s0, 2 }
 0x158   : > { %s697_s14 = sand.u32 1, %s2095_s15  }
 0x159   : > { %p2097_p8 = scmp.ne.s32.totalorder %s2096_s18, 0  ;;  %s698_s16 = scalar_lea.sflag [#allocation4], %s697_s14 }
 0x15b   : > { %p871_p9 = pnand %p877_p0, %p2097_p8 }
 0x15d   : > { %p872_p10 = pneg %p871_p9 }
 0x15f   : > { %1017 = dma.done.wait (%p872_p10), %s698_s16, 1024  }
 0x160   : > { %1019 = vsyncadd (%p872_p10), %s698_s16, 4294966272  ;;  %s2098_s12 = sld [smem:[#allocation16_spill]] }
 0x161   : > { %s2099_s9 = sld [smem:[#allocation12_spill]] }
 0x162   : > { %s2100_s10 = sld [smem:[#allocation13_spill]] }
 0x163   : > { %s2101_s11 = sld [smem:[#allocation17_spill]] }
 0x166   : > { %p16_p1 = scmp.ge.s32.totalorder %s2098_s12, 10  }
 0x168   :  { %18 = sbr.rel (!%p16_p1) target bundleno = 10 (0xa), region = 92 }
 0x16d   :  { %703 = vsyncpa [#allocation3], 1 }
 0x16e   :  { %705 = vsyncpa [#allocation3 + $0x1], 1 }
 0x16f   :  { %706 = vsyncpa [#allocation4], 1 }
 0x170   :  { %708 = vsyncpa [#allocation4 + $0x1], 1 }
 0x171   :  { %709 = vsyncpa [#allocation5], 1 }
 0x172   :  { %711 = vsyncpa [#allocation5 + $0x1], 1 }

</bundles_post_ra>
